<compile_context>
chip_gen: v7x
topology: tpu7x:2x2x1
jax: 0.10.0
libtpu: 0.0.40
codegen_flags: <defaults>
</compile_context>

<pallas_src>
import functools

import jax
import jax.numpy as jnp
from jax.experimental import pallas as pl
from jax.experimental.pallas import tpu as pltpu


# ----------------------------------------------------------------------------
# Model config (small synthetic stand-in for EfficientNet-B4 + BioGPT-large)
# ----------------------------------------------------------------------------
IN_CH = 3            # image channels
STEM_CH = 16         # conv stem channels
IMG_DIM = 32         # pooled image feature projection
HIDDEN = 32          # decoder hidden size
HEADS = 4
HEAD_DIM = HIDDEN // HEADS
VOCAB = 64
V_PAD = 128          # vocab padded to a full 128-lane vreg (lane-dense store)
MLP_DIM = 4 * HIDDEN # 128 -> already lane dense
MAX_POS = 32
K_PATCH = 3 * 3 * IN_CH   # im2col contraction dim (27)
K_PAD = 32                # padded contraction width
LANES = 128
NEG_INF = -1e30

# ---- packed bf16 weight slab: row offsets (every block lane-padded to 128) --
W_CONV = 0                       # (K_PAD,   STEM_CH)
W_PROJ = W_CONV + K_PAD          # (STEM_CH, IMG_DIM)
W_IPJ  = W_PROJ + STEM_CH        # (IMG_DIM, HIDDEN)
W_QKV  = W_IPJ + IMG_DIM         # (HIDDEN,  3*HIDDEN)
W_AO   = W_QKV + HIDDEN          # (HIDDEN,  HIDDEN)   head h rows: W_AO+h*HEAD_DIM
W_MLP1 = W_AO + HIDDEN           # (HIDDEN,  MLP_DIM)
W_MLP2 = W_MLP1 + HIDDEN         # (MLP_DIM, HIDDEN)
W_LM   = W_MLP2 + MLP_DIM        # (HIDDEN,  V_PAD)
W_ROWS = W_LM + HIDDEN           # 336 rows total (multiple of 8)

# ---- packed f32 bias / LN-gain slab: one row each, lane-padded to 128 -------
(B_CONV, B_PROJ, B_IPJ, B_LN1G, B_LN1B, B_QKV, B_AO,
 B_LN2G, B_LN2B, B_MLP1, B_MLP2, B_LNFG, B_LNFB, B_LM) = range(14)
B_ROWS = 16


def init_params(key):
    ks = jax.random.split(key, 16)
    p = {}
    # image encoder: conv stem (as matmul over im2col patches) + projection
    p["conv_w"] = 0.1 * jax.random.normal(ks[0], (K_PAD, STEM_CH), jnp.float32)
    p["conv_b"] = jnp.zeros((STEM_CH,), jnp.float32)
    p["proj_w"] = 0.1 * jax.random.normal(ks[1], (STEM_CH, IMG_DIM), jnp.float32)
    p["proj_b"] = jnp.zeros((IMG_DIM,), jnp.float32)
    # text decoder
    p["img_proj_w"] = 0.1 * jax.random.normal(ks[2], (IMG_DIM, HIDDEN), jnp.float32)
    p["img_proj_b"] = jnp.zeros((HIDDEN,), jnp.float32)
    p["tok_emb"] = 0.02 * jax.random.normal(ks[3], (VOCAB, HIDDEN), jnp.float32)
    p["pos_emb"] = 0.02 * jax.random.normal(ks[4], (MAX_POS, HIDDEN), jnp.float32)
    p["ln1_g"] = jnp.ones((HIDDEN,), jnp.float32)
    p["ln1_b"] = jnp.zeros((HIDDEN,), jnp.float32)
    p["qkv_w"] = 0.1 * jax.random.normal(ks[5], (HIDDEN, 3 * HIDDEN), jnp.float32)
    p["qkv_b"] = jnp.zeros((3 * HIDDEN,), jnp.float32)
    p["attn_out_w"] = 0.1 * jax.random.normal(ks[6], (HIDDEN, HIDDEN), jnp.float32)
    p["attn_out_b"] = jnp.zeros((HIDDEN,), jnp.float32)
    p["ln2_g"] = jnp.ones((HIDDEN,), jnp.float32)
    p["ln2_b"] = jnp.zeros((HIDDEN,), jnp.float32)
    p["mlp1_w"] = 0.1 * jax.random.normal(ks[7], (HIDDEN, MLP_DIM), jnp.float32)
    p["mlp1_b"] = jnp.zeros((MLP_DIM,), jnp.float32)
    p["mlp2_w"] = 0.1 * jax.random.normal(ks[8], (MLP_DIM, HIDDEN), jnp.float32)
    p["mlp2_b"] = jnp.zeros((HIDDEN,), jnp.float32)
    p["lnf_g"] = jnp.ones((HIDDEN,), jnp.float32)
    p["lnf_b"] = jnp.zeros((HIDDEN,), jnp.float32)
    p["lm_w"] = 0.1 * jax.random.normal(ks[9], (HIDDEN, VOCAB), jnp.float32)
    p["lm_b"] = jnp.zeros((VOCAB,), jnp.float32)
    return p


def _pack_param_slabs(p):
    """Pack all weights into one bf16 (W_ROWS,128) slab and all biases/LN
    params into one f32 (B_ROWS,128) slab (lane-dense, two DMAs total)."""
    bf16 = jnp.bfloat16

    def lane_pad(w):
        return jnp.pad(w, ((0, 0), (0, LANES - w.shape[1])))

    w_blocks = [
        p["conv_w"],                                        # rows W_CONV
        p["proj_w"],                                        # rows W_PROJ
        p["img_proj_w"],                                    # rows W_IPJ
        p["qkv_w"],                                         # rows W_QKV
        p["attn_out_w"],                                    # rows W_AO
        p["mlp1_w"],                                        # rows W_MLP1
        p["mlp2_w"],                                        # rows W_MLP2
        jnp.pad(p["lm_w"], ((0, 0), (0, V_PAD - VOCAB))),   # rows W_LM
    ]
    w_slab = jnp.concatenate([lane_pad(b) for b in w_blocks], axis=0).astype(bf16)

    b_rows = [
        p["conv_b"], p["proj_b"], p["img_proj_b"], p["ln1_g"], p["ln1_b"],
        p["qkv_b"], p["attn_out_b"], p["ln2_g"], p["ln2_b"],
        p["mlp1_b"], p["mlp2_b"], p["lnf_g"], p["lnf_b"],
        jnp.pad(p["lm_b"], (0, V_PAD - VOCAB)),
    ]
    b_slab = jnp.zeros((B_ROWS, LANES), jnp.float32)
    for i, r in enumerate(b_rows):
        b_slab = b_slab.at[i, : r.shape[0]].set(r.astype(jnp.float32))
    return w_slab, b_slab


# ----------------------------------------------------------------------------
# The single fused Pallas kernel (one grid step per batch element)
# ----------------------------------------------------------------------------
def _fused_fwd_kernel(patches_ref, seq_ref, w_ref, b_ref, out_ref,
                      *, seq_pad, n_text, scale, eps):
  f32 = jnp.float32
  bf16 = jnp.bfloat16

  def bias(r, c):                 # (1, c) f32 row of the bias slab
    return b_ref[r:r + 1, 0:c]

  # ---------- image encoder: conv stem (im2col matmul) + SiLU + GAP + proj ---
  patches = patches_ref[0]                                        # (P, K_PAD) bf16
  feat = jnp.dot(patches, w_ref[W_CONV:W_CONV + K_PAD, 0:STEM_CH],
                 preferred_element_type=f32) + bias(B_CONV, STEM_CH)
  feat = feat * jax.nn.sigmoid(feat)                              # SiLU (f32)
  pooled = jnp.mean(feat, axis=0, keepdims=True)                  # GAP: XLU reduce
  img_emb = jnp.dot(pooled.astype(bf16),
                    w_ref[W_PROJ:W_PROJ + STEM_CH, 0:IMG_DIM],
                    preferred_element_type=f32) + bias(B_PROJ, IMG_DIM)
  img_tok = jnp.dot(img_emb.astype(bf16),
                    w_ref[W_IPJ:W_IPJ + IMG_DIM, 0:HIDDEN],
                    preferred_element_type=f32) + bias(B_IPJ, HIDDEN)  # (1, D)

  # ---------- decoder input: image prefix at row 0 + token/pos embeddings ----
  seq = seq_ref[0]                                                # (S_PAD, 128) f32
  tokpos = seq[:, 0:HIDDEN]
  labels = seq[:, HIDDEN:HIDDEN + 1].astype(jnp.int32)            # (S_PAD, 1)
  row = jax.lax.broadcasted_iota(jnp.int32, (seq_pad, 1), 0)
  x = tokpos + jnp.where(row == 0, img_tok, 0.0)                  # residual (f32)

  def layernorm(v, gr, br):
    m = jnp.mean(v, axis=-1, keepdims=True)
    c = v - m
    var = jnp.mean(c * c, axis=-1, keepdims=True)
    return c * jax.lax.rsqrt(var + eps) * bias(gr, HIDDEN) + bias(br, HIDDEN)

  # ---------- self-attention (all heads, bf16 MXU operands, f32 softmax) -----
  h1 = layernorm(x, B_LN1G, B_LN1B).astype(bf16)
  qkv = jnp.dot(h1, w_ref[W_QKV:W_QKV + HIDDEN, 0:3 * HIDDEN],
                preferred_element_type=f32) + bias(B_QKV, 3 * HIDDEN)
  qkv_b = qkv.astype(bf16)
  q = qkv_b[:, 0 * HIDDEN:1 * HIDDEN]
  k = qkv_b[:, 1 * HIDDEN:2 * HIDDEN]
  v = qkv_b[:, 2 * HIDDEN:3 * HIDDEN]

  rq = jax.lax.broadcasted_iota(jnp.int32, (seq_pad, seq_pad), 0)
  ck = jax.lax.broadcasted_iota(jnp.int32, (seq_pad, seq_pad), 1)
  causal = ck <= rq
  dn = (((1,), (1,)), ((), ()))          # contract last dims -> q @ k^T, no .T

  attn_out = jnp.zeros((seq_pad, HIDDEN), f32)
  for hh in range(HEADS):                                         # static unroll
    sl = slice(hh * HEAD_DIM, (hh + 1) * HEAD_DIM)
    qh, kh, vh = q[:, sl], k[:, sl], v[:, sl]
    s = jax.lax.dot_general(qh, kh, dn, preferred_element_type=f32) * scale
    s = jnp.where(causal, s, NEG_INF)
    s = s - jnp.max(s, axis=-1, keepdims=True)
    pr = jnp.exp(s)
    pr = pr * pl.reciprocal(jnp.sum(pr, axis=-1, keepdims=True), approx=True)
    oh = jnp.dot(pr.astype(bf16), vh, preferred_element_type=f32)  # (S, Dh)
    # fold the per-head slice of the output projection in here (sublane slice
    # of the packed weight slab; avoids an in-kernel concat of head outputs).
    wo_h = w_ref[W_AO + hh * HEAD_DIM:W_AO + (hh + 1) * HEAD_DIM, 0:HIDDEN]
    attn_out = attn_out + jnp.dot(oh.astype(bf16), wo_h,
                                  preferred_element_type=f32)
  x = x + attn_out + bias(B_AO, HIDDEN)

  # ---------- MLP ------------------------------------------------------------
  h2 = layernorm(x, B_LN2G, B_LN2B).astype(bf16)
  m = jnp.dot(h2, w_ref[W_MLP1:W_MLP1 + HIDDEN, 0:MLP_DIM],
              preferred_element_type=f32) + bias(B_MLP1, MLP_DIM)
  # TODO(synk): PyTorch nn.GELU defaults to exact erf; tanh approximation used.
  m = jax.nn.gelu(m, approximate=True)
  x = x + jnp.dot(m.astype(bf16), w_ref[W_MLP2:W_MLP2 + MLP_DIM, 0:HIDDEN],
                  preferred_element_type=f32) + bias(B_MLP2, HIDDEN)

  # ---------- LM head (vocab padded to 128 lanes -> lane-dense store) --------
  hf = layernorm(x, B_LNFG, B_LNFB).astype(bf16)
  logits = jnp.dot(hf, w_ref[W_LM:W_LM + HIDDEN, 0:V_PAD],
                   preferred_element_type=f32) + bias(B_LM, V_PAD)  # (S, V_PAD)

  # ---------- fused shifted cross-entropy (per-token NLL) --------------------
  lane = jax.lax.broadcasted_iota(jnp.int32, (seq_pad, V_PAD), 1)
  lg = jnp.where(lane < VOCAB, logits, NEG_INF)                   # mask pad lanes
  mx = jnp.max(lg, axis=-1, keepdims=True)
  lse = jnp.log(jnp.sum(jnp.exp(lg - mx), axis=-1, keepdims=True)) + mx
  onehot = (lane == labels).astype(f32)
  tgt = jnp.sum(onehot * lg, axis=-1, keepdims=True)
  valid = row < n_text                                            # positions 0..T-1
  nll = jnp.where(valid, lse - tgt, 0.0)                          # (S, 1)

  # pack per-token NLL into the spare vocab lane (== VOCAB) of the logits slab
  out = jnp.where(lane == VOCAB, nll, logits)
  out_ref[0] = out.astype(out_ref.dtype)


# ----------------------------------------------------------------------------
# Wrapper (plain-JAX glue: im2col, embedding gather, slab packing, final mean)
# ----------------------------------------------------------------------------
def chest_xray_report_generator(p, images, input_ids, labels=None):
  B = images.shape[0]
  T = input_ids.shape[1]
  S = T + 1                                   # image prefix + text tokens
  S_PAD = max(8, -(-S // 8) * 8)              # pad seq to a multiple of 8 sublanes
  bf16 = jnp.bfloat16

  # ---- im2col (glue): NCHW -> (B, P, K_PAD) patch slab, PyTorch pad=1, s=2 --
  patches = jax.lax.conv_general_dilated_patches(
      images, filter_shape=(3, 3), window_strides=(2, 2),
      padding=((1, 1), (1, 1)))               # (B, C*9, Ho, Wo)
  _, CK, Ho, Wo = patches.shape
  P = Ho * Wo
  patches = jnp.transpose(patches, (0, 2, 3, 1)).reshape(B, P, CK)
  patches = jnp.pad(patches, ((0, 0), (0, 0), (0, K_PAD - CK))).astype(bf16)

  # ---- per-batch sequence slab (lane-dense 128): tok+pos emb + labels lane --
  tok = jnp.take(p["tok_emb"], input_ids, axis=0)                  # (B, T, D)
  row0 = jnp.broadcast_to(p["pos_emb"][0:1][None], (B, 1, HIDDEN))
  body = tok + p["pos_emb"][1:S][None]
  tokpos = jnp.concatenate([row0, body], axis=1)                   # (B, S, D)

  seq_in = jnp.zeros((B, S_PAD, LANES), jnp.float32)
  seq_in = seq_in.at[:, :S, :HIDDEN].set(tokpos)
  if labels is not None:
    seq_in = seq_in.at[:, :T, HIDDEN].set(labels.astype(jnp.float32))

  # ---- packed parameter slabs (2 DMAs instead of ~22) ------------------------
  w_slab, b_slab = _pack_param_slabs(p)

  operands = [patches, seq_in, w_slab, b_slab]
  in_specs = [
      pl.BlockSpec((1, P, K_PAD), lambda b: (b, 0, 0)),
      pl.BlockSpec((1, S_PAD, LANES), lambda b: (b, 0, 0)),
      pl.BlockSpec((W_ROWS, LANES), lambda b: (0, 0)),
      pl.BlockSpec((B_ROWS, LANES), lambda b: (0, 0)),
  ]
  out_shape = jax.ShapeDtypeStruct((B, S_PAD, V_PAD), jnp.float32)
  out_specs = pl.BlockSpec((1, S_PAD, V_PAD), lambda b: (b, 0, 0))

  flops = int(B * (
      2 * P * K_PAD * STEM_CH
      + 2 * STEM_CH * IMG_DIM + 2 * IMG_DIM * HIDDEN
      + 2 * S_PAD * HIDDEN * 3 * HIDDEN
      + HEADS * (4 * S_PAD * S_PAD * HEAD_DIM + 2 * S_PAD * HEAD_DIM * HIDDEN)
      + 4 * S_PAD * HIDDEN * MLP_DIM
      + 2 * S_PAD * HIDDEN * V_PAD))
  transcendentals = int(B * (P * STEM_CH + HEADS * S_PAD * S_PAD
                             + S_PAD * MLP_DIM + 2 * S_PAD * V_PAD))
  bytes_accessed = int(patches.size * 2 + seq_in.size * 4
                       + w_slab.size * 2 + b_slab.size * 4
                       + B * S_PAD * V_PAD * 4)
  cost = pl.CostEstimate(flops=flops, transcendentals=transcendentals,
                         bytes_accessed=bytes_accessed)

  kernel = functools.partial(
      _fused_fwd_kernel, seq_pad=S_PAD, n_text=T,
      scale=1.0 / (HEAD_DIM ** 0.5), eps=1e-5)

  out = pl.pallas_call(
      kernel,
      out_shape=out_shape,
      grid_spec=pltpu.PrefetchScalarGridSpec(
          num_scalar_prefetch=0, grid=(B,),
          in_specs=in_specs, out_specs=out_specs),
      compiler_params=pltpu.CompilerParams(
          dimension_semantics=("parallel",)),
      cost_estimate=cost,
  )(*operands)

  logits = out[:, :S, :VOCAB]                              # (B, T+1, VOCAB)
  if labels is None:
    return None, logits
  loss = jnp.sum(out[:, :, VOCAB]) / (B * T)               # mean NLL (glue)
  return loss, logits
  # TODO(synk): autoregressive generate_text() (greedy/beam decode) not implemented;
  # only the training forward pass is reproduced here.


# ----------------------------------------------------------------------------
if __name__ == "__main__":
  key = jax.random.PRNGKey(0)
  k_img, k_ids, k_lbl = jax.random.split(key, 3)

  B, HW, T = 2, 16, 8
  images = jax.random.normal(k_img, (B, IN_CH, HW, HW), jnp.float32)   # NCHW
  input_ids = jax.random.randint(k_ids, (B, T), 0, VOCAB, jnp.int32)
  labels = jax.random.randint(k_lbl, (B, T), 0, VOCAB, jnp.int32)

  params = init_params(jax.random.PRNGKey(42))

  fwd = jax.jit(chest_xray_report_generator)
  loss, logits = fwd(params, images, input_ids, labels)
  jax.block_until_ready((loss, logits))
  assert logits.shape == (B, T + 1, VOCAB)
  assert loss.shape == ()
  assert bool(jnp.isfinite(loss))
  print("KERNEL_OK")
</pallas_src>

<mosaic_0001>
module attributes {stable_mosaic.version = 11 : i64} {
  func.func @_fused_fwd_kernel(%arg0: i32, %arg1: memref<1x64x32xbf16, #tpu.memory_space<vmem>>, %arg2: memref<1x16x128xf32, #tpu.memory_space<vmem>>, %arg3: memref<336x128xbf16, #tpu.memory_space<vmem>>, %arg4: memref<16x128xf32, #tpu.memory_space<vmem>>, %arg5: memref<1x16x128xf32, #tpu.memory_space<vmem>>) attributes {dimension_semantics = [#tpu.dimension_semantics<parallel>], iteration_bounds = array<i64: 2>, scalar_prefetch = 0 : i64, scratch_operands = 0 : i64, tpu.core_type = #tpu.core_type<tc>, window_params = [{transform_indices = @transform_0, window_bounds = array<i64: 1, 64, 32>}, {transform_indices = @transform_1, window_bounds = array<i64: 1, 16, 128>}, {pipeline_mode = #tpu.pipeline_mode<synchronous>, transform_indices = @transform_2, window_bounds = array<i64: 336, 128>}, {pipeline_mode = #tpu.pipeline_mode<synchronous>, transform_indices = @transform_3, window_bounds = array<i64: 16, 128>}, {transform_indices = @transform_4, window_bounds = array<i64: 1, 16, 128>}]} {
    %c0 = arith.constant 0 : index
    %c0_0 = arith.constant 0 : index
    %c0_1 = arith.constant 0 : index
    %0 = vector.load %arg1[%c0, %c0_0, %c0_1] : memref<1x64x32xbf16, #tpu.memory_space<vmem>>, vector<1x64x32xbf16>
    %1 = vector.shape_cast %0 : vector<1x64x32xbf16> to vector<64x32xbf16>
    %c0_2 = arith.constant 0 : index
    %c0_3 = arith.constant 0 : index
    %2 = vector.load %arg3[%c0_2, %c0_3] : memref<336x128xbf16, #tpu.memory_space<vmem>>, vector<32x16xbf16>
    %cst = arith.constant dense<0.000000e+00> : vector<64x16xf32>
    %3 = tpu.matmul %1, %2, %cst {dimension_numbers = #tpu.dot_dimension_numbers<[1], [0], [0], [1], [0, 0, 1, 1], [], []>} : vector<64x32xbf16>, vector<32x16xbf16>, vector<64x16xf32> -> vector<64x16xf32>
    %c0_4 = arith.constant 0 : index
    %c0_5 = arith.constant 0 : index
    %4 = vector.load %arg4[%c0_4, %c0_5] : memref<16x128xf32, #tpu.memory_space<vmem>>, vector<1x16xf32>
    %5 = vector.broadcast %4 : vector<1x16xf32> to vector<64x16xf32>
    %6 = arith.addf %3, %5 : vector<64x16xf32>
    %7 = arith.negf %6 : vector<64x16xf32>
    %8 = math.exp %7 : vector<64x16xf32>
    %cst_6 = arith.constant 1.000000e+00 : f32
    %9 = vector.broadcast %cst_6 : f32 to vector<64x16xf32>
    %10 = arith.addf %9, %8 : vector<64x16xf32>
    %11 = arith.divf %9, %10 : vector<64x16xf32>
    %12 = arith.mulf %6, %11 : vector<64x16xf32>
    %cst_7 = arith.constant dense<0.000000e+00> : vector<16xf32>
    %13 = vector.multi_reduction <add>, %12, %cst_7 [0] : vector<64x16xf32> to vector<16xf32>
    %14 = vector.shape_cast %13 : vector<16xf32> to vector<1x16xf32>
    %cst_8 = arith.constant 6.400000e+01 : f32
    %15 = vector.broadcast %cst_8 : f32 to vector<1x16xf32>
    %16 = arith.divf %14, %15 : vector<1x16xf32>
    %17 = arith.truncf %16 : vector<1x16xf32> to vector<1x16xbf16>
    %c32 = arith.constant 32 : index
    %c0_9 = arith.constant 0 : index
    %18 = vector.load %arg3[%c32, %c0_9] : memref<336x128xbf16, #tpu.memory_space<vmem>>, vector<16x32xbf16>
    %cst_10 = arith.constant dense<0.000000e+00> : vector<1x32xf32>
    %19 = tpu.matmul %17, %18, %cst_10 {dimension_numbers = #tpu.dot_dimension_numbers<[1], [0], [0], [1], [0, 0, 1, 1], [], []>} : vector<1x16xbf16>, vector<16x32xbf16>, vector<1x32xf32> -> vector<1x32xf32>
    %c1 = arith.constant 1 : index
    %c0_11 = arith.constant 0 : index
    %20 = vector.load %arg4[%c1, %c0_11] : memref<16x128xf32, #tpu.memory_space<vmem>>, vector<1x32xf32>
    %21 = arith.addf %19, %20 : vector<1x32xf32>
    %22 = arith.truncf %21 : vector<1x32xf32> to vector<1x32xbf16>
    %c48 = arith.constant 48 : index
    %c0_12 = arith.constant 0 : index
    %23 = vector.load %arg3[%c48, %c0_12] : memref<336x128xbf16, #tpu.memory_space<vmem>>, vector<32x32xbf16>
    %cst_13 = arith.constant dense<0.000000e+00> : vector<1x32xf32>
    %24 = tpu.matmul %22, %23, %cst_13 {dimension_numbers = #tpu.dot_dimension_numbers<[1], [0], [0], [1], [0, 0, 1, 1], [], []>} : vector<1x32xbf16>, vector<32x32xbf16>, vector<1x32xf32> -> vector<1x32xf32>
    %c2 = arith.constant 2 : index
    %c0_14 = arith.constant 0 : index
    %25 = vector.load %arg4[%c2, %c0_14] : memref<16x128xf32, #tpu.memory_space<vmem>>, vector<1x32xf32>
    %26 = arith.addf %24, %25 : vector<1x32xf32>
    %c0_15 = arith.constant 0 : index
    %c0_16 = arith.constant 0 : index
    %c0_17 = arith.constant 0 : index
    %27 = vector.load %arg2[%c0_15, %c0_16, %c0_17] : memref<1x16x128xf32, #tpu.memory_space<vmem>>, vector<1x16x128xf32>
    %28 = vector.shape_cast %27 : vector<1x16x128xf32> to vector<16x128xf32>
    %29 = vector.extract_strided_slice %28 {offsets = [0, 0], sizes = [16, 32], strides = [1, 1]} : vector<16x128xf32> to vector<16x32xf32>
    %30 = vector.extract_strided_slice %28 {offsets = [0, 32], sizes = [16, 1], strides = [1, 1]} : vector<16x128xf32> to vector<16x1xf32>
    %31 = arith.fptosi %30 : vector<16x1xf32> to vector<16x1xi32>
    %32 = tpu.iota {dimensions = array<i32: 0>} : vector<16x1xi32>
    %c0_i32 = arith.constant 0 : i32
    %33 = vector.broadcast %c0_i32 : i32 to vector<16x1xi32>
    %34 = arith.cmpi eq, %32, %33 : vector<16x1xi32>
    %cst_18 = arith.constant 0.000000e+00 : f32
    %35 = vector.shape_cast %34 : vector<16x1xi1> to vector<16x1xi1>
    %36 = vector.broadcast %35 : vector<16x1xi1> to vector<16x32xi1>
    %37 = vector.shape_cast %26 : vector<1x32xf32> to vector<1x32xf32>
    %38 = vector.broadcast %37 : vector<1x32xf32> to vector<16x32xf32>
    %39 = vector.broadcast %cst_18 : f32 to vector<16x32xf32>
    %40 = arith.select %36, %38, %39 : vector<16x32xi1>, vector<16x32xf32>
    %41 = arith.addf %29, %40 : vector<16x32xf32>
    %cst_19 = arith.constant dense<0.000000e+00> : vector<16xf32>
    %42 = vector.multi_reduction <add>, %41, %cst_19 [1] : vector<16x32xf32> to vector<16xf32>
    %43 = vector.shape_cast %42 : vector<16xf32> to vector<16x1xf32>
    %cst_20 = arith.constant 3.200000e+01 : f32
    %44 = vector.broadcast %cst_20 : f32 to vector<16x1xf32>
    %45 = arith.divf %43, %44 : vector<16x1xf32>
    %46 = vector.broadcast %45 : vector<16x1xf32> to vector<16x32xf32>
    %47 = arith.subf %41, %46 : vector<16x32xf32>
    %48 = arith.mulf %47, %47 : vector<16x32xf32>
    %cst_21 = arith.constant dense<0.000000e+00> : vector<16xf32>
    %49 = vector.multi_reduction <add>, %48, %cst_21 [1] : vector<16x32xf32> to vector<16xf32>
    %50 = vector.shape_cast %49 : vector<16xf32> to vector<16x1xf32>
    %cst_22 = arith.constant 3.200000e+01 : f32
    %51 = vector.broadcast %cst_22 : f32 to vector<16x1xf32>
    %52 = arith.divf %50, %51 : vector<16x1xf32>
    %cst_23 = arith.constant 9.99999974E-6 : f32
    %53 = vector.broadcast %cst_23 : f32 to vector<16x1xf32>
    %54 = arith.addf %52, %53 : vector<16x1xf32>
    %55 = math.rsqrt %54 : vector<16x1xf32>
    %56 = vector.broadcast %55 : vector<16x1xf32> to vector<16x32xf32>
    %57 = arith.mulf %47, %56 : vector<16x32xf32>
    %c3 = arith.constant 3 : index
    %c0_24 = arith.constant 0 : index
    %58 = vector.load %arg4[%c3, %c0_24] : memref<16x128xf32, #tpu.memory_space<vmem>>, vector<1x32xf32>
    %59 = vector.broadcast %58 : vector<1x32xf32> to vector<16x32xf32>
    %60 = arith.mulf %57, %59 : vector<16x32xf32>
    %c4 = arith.constant 4 : index
    %c0_25 = arith.constant 0 : index
    %61 = vector.load %arg4[%c4, %c0_25] : memref<16x128xf32, #tpu.memory_space<vmem>>, vector<1x32xf32>
    %62 = vector.broadcast %61 : vector<1x32xf32> to vector<16x32xf32>
    %63 = arith.addf %60, %62 : vector<16x32xf32>
    %64 = arith.truncf %63 : vector<16x32xf32> to vector<16x32xbf16>
    %c80 = arith.constant 80 : index
    %c0_26 = arith.constant 0 : index
    %65 = vector.load %arg3[%c80, %c0_26] : memref<336x128xbf16, #tpu.memory_space<vmem>>, vector<32x96xbf16>
    %cst_27 = arith.constant dense<0.000000e+00> : vector<16x96xf32>
    %66 = tpu.matmul %64, %65, %cst_27 {dimension_numbers = #tpu.dot_dimension_numbers<[1], [0], [0], [1], [0, 0, 1, 1], [], []>} : vector<16x32xbf16>, vector<32x96xbf16>, vector<16x96xf32> -> vector<16x96xf32>
    %c5 = arith.constant 5 : index
    %c0_28 = arith.constant 0 : index
    %67 = vector.load %arg4[%c5, %c0_28] : memref<16x128xf32, #tpu.memory_space<vmem>>, vector<1x96xf32>
    %68 = vector.broadcast %67 : vector<1x96xf32> to vector<16x96xf32>
    %69 = arith.addf %66, %68 : vector<16x96xf32>
    %70 = arith.truncf %69 : vector<16x96xf32> to vector<16x96xbf16>
    %71 = vector.extract_strided_slice %70 {offsets = [0, 0], sizes = [16, 32], strides = [1, 1]} : vector<16x96xbf16> to vector<16x32xbf16>
    %72 = vector.extract_strided_slice %70 {offsets = [0, 32], sizes = [16, 32], strides = [1, 1]} : vector<16x96xbf16> to vector<16x32xbf16>
    %73 = vector.extract_strided_slice %70 {offsets = [0, 64], sizes = [16, 32], strides = [1, 1]} : vector<16x96xbf16> to vector<16x32xbf16>
    %74 = tpu.iota {dimensions = array<i32: 0>} : vector<16x16xi32>
    %75 = tpu.iota {dimensions = array<i32: 1>} : vector<16x16xi32>
    %76 = arith.cmpi sle, %75, %74 : vector<16x16xi32>
    %cst_29 = arith.constant 0.000000e+00 : f32
    %77 = vector.broadcast %cst_29 : f32 to vector<16x32xf32>
    %78 = vector.extract_strided_slice %71 {offsets = [0, 0], sizes = [16, 8], strides = [1, 1]} : vector<16x32xbf16> to vector<16x8xbf16>
    %79 = vector.extract_strided_slice %72 {offsets = [0, 0], sizes = [16, 8], strides = [1, 1]} : vector<16x32xbf16> to vector<16x8xbf16>
    %80 = vector.extract_strided_slice %73 {offsets = [0, 0], sizes = [16, 8], strides = [1, 1]} : vector<16x32xbf16> to vector<16x8xbf16>
    %cst_30 = arith.constant dense<0.000000e+00> : vector<16x16xf32>
    %81 = tpu.matmul %78, %79, %cst_30 {dimension_numbers = #tpu.dot_dimension_numbers<[1], [1], [0], [0], [0, 0, 1, 0], [], []>} : vector<16x8xbf16>, vector<16x8xbf16>, vector<16x16xf32> -> vector<16x16xf32>
    %cst_31 = arith.constant 0.353553385 : f32
    %82 = vector.broadcast %cst_31 : f32 to vector<16x16xf32>
    %83 = arith.mulf %81, %82 : vector<16x16xf32>
    %cst_32 = arith.constant -1.000000e+30 : f32
    %84 = vector.broadcast %cst_32 : f32 to vector<16x16xf32>
    %85 = arith.select %76, %83, %84 : vector<16x16xi1>, vector<16x16xf32>
    %cst_33 = arith.constant dense<0xFF800000> : vector<16xf32>
    %86 = vector.multi_reduction <maximumf>, %85, %cst_33 [1] : vector<16x16xf32> to vector<16xf32>
    %87 = vector.shape_cast %86 : vector<16xf32> to vector<16x1xf32>
    %88 = vector.broadcast %87 : vector<16x1xf32> to vector<16x16xf32>
    %89 = arith.subf %85, %88 : vector<16x16xf32>
    %90 = math.exp %89 : vector<16x16xf32>
    %cst_34 = arith.constant dense<0.000000e+00> : vector<16xf32>
    %91 = vector.multi_reduction <add>, %90, %cst_34 [1] : vector<16x16xf32> to vector<16xf32>
    %92 = vector.shape_cast %91 : vector<16xf32> to vector<16x1xf32>
    %93 = tpu.reciprocal %92 {approx = true} : vector<16x1xf32> -> vector<16x1xf32>
    %94 = vector.broadcast %93 : vector<16x1xf32> to vector<16x16xf32>
    %95 = arith.mulf %90, %94 : vector<16x16xf32>
    %96 = arith.truncf %95 : vector<16x16xf32> to vector<16x16xbf16>
    %cst_35 = arith.constant dense<0.000000e+00> : vector<16x8xf32>
    %97 = tpu.matmul %96, %80, %cst_35 {dimension_numbers = #tpu.dot_dimension_numbers<[1], [0], [0], [1], [0, 0, 1, 1], [], []>} : vector<16x16xbf16>, vector<16x8xbf16>, vector<16x8xf32> -> vector<16x8xf32>
    %c112 = arith.constant 112 : index
    %c0_36 = arith.constant 0 : index
    %98 = vector.load %arg3[%c112, %c0_36] : memref<336x128xbf16, #tpu.memory_space<vmem>>, vector<8x32xbf16>
    %99 = arith.truncf %97 : vector<16x8xf32> to vector<16x8xbf16>
    %cst_37 = arith.constant dense<0.000000e+00> : vector<16x32xf32>
    %100 = tpu.matmul %99, %98, %cst_37 {dimension_numbers = #tpu.dot_dimension_numbers<[1], [0], [0], [1], [0, 0, 1, 1], [], []>} : vector<16x8xbf16>, vector<8x32xbf16>, vector<16x32xf32> -> vector<16x32xf32>
    %101 = arith.addf %77, %100 : vector<16x32xf32>
    %102 = vector.extract_strided_slice %71 {offsets = [0, 8], sizes = [16, 8], strides = [1, 1]} : vector<16x32xbf16> to vector<16x8xbf16>
    %103 = vector.extract_strided_slice %72 {offsets = [0, 8], sizes = [16, 8], strides = [1, 1]} : vector<16x32xbf16> to vector<16x8xbf16>
    %104 = vector.extract_strided_slice %73 {offsets = [0, 8], sizes = [16, 8], strides = [1, 1]} : vector<16x32xbf16> to vector<16x8xbf16>
    %cst_38 = arith.constant dense<0.000000e+00> : vector<16x16xf32>
    %105 = tpu.matmul %102, %103, %cst_38 {dimension_numbers = #tpu.dot_dimension_numbers<[1], [1], [0], [0], [0, 0, 1, 0], [], []>} : vector<16x8xbf16>, vector<16x8xbf16>, vector<16x16xf32> -> vector<16x16xf32>
    %cst_39 = arith.constant 0.353553385 : f32
    %106 = vector.broadcast %cst_39 : f32 to vector<16x16xf32>
    %107 = arith.mulf %105, %106 : vector<16x16xf32>
    %cst_40 = arith.constant -1.000000e+30 : f32
    %108 = vector.broadcast %cst_40 : f32 to vector<16x16xf32>
    %109 = arith.select %76, %107, %108 : vector<16x16xi1>, vector<16x16xf32>
    %cst_41 = arith.constant dense<0xFF800000> : vector<16xf32>
    %110 = vector.multi_reduction <maximumf>, %109, %cst_41 [1] : vector<16x16xf32> to vector<16xf32>
    %111 = vector.shape_cast %110 : vector<16xf32> to vector<16x1xf32>
    %112 = vector.broadcast %111 : vector<16x1xf32> to vector<16x16xf32>
    %113 = arith.subf %109, %112 : vector<16x16xf32>
    %114 = math.exp %113 : vector<16x16xf32>
    %cst_42 = arith.constant dense<0.000000e+00> : vector<16xf32>
    %115 = vector.multi_reduction <add>, %114, %cst_42 [1] : vector<16x16xf32> to vector<16xf32>
    %116 = vector.shape_cast %115 : vector<16xf32> to vector<16x1xf32>
    %117 = tpu.reciprocal %116 {approx = true} : vector<16x1xf32> -> vector<16x1xf32>
    %118 = vector.broadcast %117 : vector<16x1xf32> to vector<16x16xf32>
    %119 = arith.mulf %114, %118 : vector<16x16xf32>
    %120 = arith.truncf %119 : vector<16x16xf32> to vector<16x16xbf16>
    %cst_43 = arith.constant dense<0.000000e+00> : vector<16x8xf32>
    %121 = tpu.matmul %120, %104, %cst_43 {dimension_numbers = #tpu.dot_dimension_numbers<[1], [0], [0], [1], [0, 0, 1, 1], [], []>} : vector<16x16xbf16>, vector<16x8xbf16>, vector<16x8xf32> -> vector<16x8xf32>
    %c120 = arith.constant 120 : index
    %c0_44 = arith.constant 0 : index
    %122 = vector.load %arg3[%c120, %c0_44] : memref<336x128xbf16, #tpu.memory_space<vmem>>, vector<8x32xbf16>
    %123 = arith.truncf %121 : vector<16x8xf32> to vector<16x8xbf16>
    %cst_45 = arith.constant dense<0.000000e+00> : vector<16x32xf32>
    %124 = tpu.matmul %123, %122, %cst_45 {dimension_numbers = #tpu.dot_dimension_numbers<[1], [0], [0], [1], [0, 0, 1, 1], [], []>} : vector<16x8xbf16>, vector<8x32xbf16>, vector<16x32xf32> -> vector<16x32xf32>
    %125 = arith.addf %101, %124 : vector<16x32xf32>
    %126 = vector.extract_strided_slice %71 {offsets = [0, 16], sizes = [16, 8], strides = [1, 1]} : vector<16x32xbf16> to vector<16x8xbf16>
    %127 = vector.extract_strided_slice %72 {offsets = [0, 16], sizes = [16, 8], strides = [1, 1]} : vector<16x32xbf16> to vector<16x8xbf16>
    %128 = vector.extract_strided_slice %73 {offsets = [0, 16], sizes = [16, 8], strides = [1, 1]} : vector<16x32xbf16> to vector<16x8xbf16>
    %cst_46 = arith.constant dense<0.000000e+00> : vector<16x16xf32>
    %129 = tpu.matmul %126, %127, %cst_46 {dimension_numbers = #tpu.dot_dimension_numbers<[1], [1], [0], [0], [0, 0, 1, 0], [], []>} : vector<16x8xbf16>, vector<16x8xbf16>, vector<16x16xf32> -> vector<16x16xf32>
    %cst_47 = arith.constant 0.353553385 : f32
    %130 = vector.broadcast %cst_47 : f32 to vector<16x16xf32>
    %131 = arith.mulf %129, %130 : vector<16x16xf32>
    %cst_48 = arith.constant -1.000000e+30 : f32
    %132 = vector.broadcast %cst_48 : f32 to vector<16x16xf32>
    %133 = arith.select %76, %131, %132 : vector<16x16xi1>, vector<16x16xf32>
    %cst_49 = arith.constant dense<0xFF800000> : vector<16xf32>
    %134 = vector.multi_reduction <maximumf>, %133, %cst_49 [1] : vector<16x16xf32> to vector<16xf32>
    %135 = vector.shape_cast %134 : vector<16xf32> to vector<16x1xf32>
    %136 = vector.broadcast %135 : vector<16x1xf32> to vector<16x16xf32>
    %137 = arith.subf %133, %136 : vector<16x16xf32>
    %138 = math.exp %137 : vector<16x16xf32>
    %cst_50 = arith.constant dense<0.000000e+00> : vector<16xf32>
    %139 = vector.multi_reduction <add>, %138, %cst_50 [1] : vector<16x16xf32> to vector<16xf32>
    %140 = vector.shape_cast %139 : vector<16xf32> to vector<16x1xf32>
    %141 = tpu.reciprocal %140 {approx = true} : vector<16x1xf32> -> vector<16x1xf32>
    %142 = vector.broadcast %141 : vector<16x1xf32> to vector<16x16xf32>
    %143 = arith.mulf %138, %142 : vector<16x16xf32>
    %144 = arith.truncf %143 : vector<16x16xf32> to vector<16x16xbf16>
    %cst_51 = arith.constant dense<0.000000e+00> : vector<16x8xf32>
    %145 = tpu.matmul %144, %128, %cst_51 {dimension_numbers = #tpu.dot_dimension_numbers<[1], [0], [0], [1], [0, 0, 1, 1], [], []>} : vector<16x16xbf16>, vector<16x8xbf16>, vector<16x8xf32> -> vector<16x8xf32>
    %c128 = arith.constant 128 : index
    %c0_52 = arith.constant 0 : index
    %146 = vector.load %arg3[%c128, %c0_52] : memref<336x128xbf16, #tpu.memory_space<vmem>>, vector<8x32xbf16>
    %147 = arith.truncf %145 : vector<16x8xf32> to vector<16x8xbf16>
    %cst_53 = arith.constant dense<0.000000e+00> : vector<16x32xf32>
    %148 = tpu.matmul %147, %146, %cst_53 {dimension_numbers = #tpu.dot_dimension_numbers<[1], [0], [0], [1], [0, 0, 1, 1], [], []>} : vector<16x8xbf16>, vector<8x32xbf16>, vector<16x32xf32> -> vector<16x32xf32>
    %149 = arith.addf %125, %148 : vector<16x32xf32>
    %150 = vector.extract_strided_slice %71 {offsets = [0, 24], sizes = [16, 8], strides = [1, 1]} : vector<16x32xbf16> to vector<16x8xbf16>
    %151 = vector.extract_strided_slice %72 {offsets = [0, 24], sizes = [16, 8], strides = [1, 1]} : vector<16x32xbf16> to vector<16x8xbf16>
    %152 = vector.extract_strided_slice %73 {offsets = [0, 24], sizes = [16, 8], strides = [1, 1]} : vector<16x32xbf16> to vector<16x8xbf16>
    %cst_54 = arith.constant dense<0.000000e+00> : vector<16x16xf32>
    %153 = tpu.matmul %150, %151, %cst_54 {dimension_numbers = #tpu.dot_dimension_numbers<[1], [1], [0], [0], [0, 0, 1, 0], [], []>} : vector<16x8xbf16>, vector<16x8xbf16>, vector<16x16xf32> -> vector<16x16xf32>
    %cst_55 = arith.constant 0.353553385 : f32
    %154 = vector.broadcast %cst_55 : f32 to vector<16x16xf32>
    %155 = arith.mulf %153, %154 : vector<16x16xf32>
    %cst_56 = arith.constant -1.000000e+30 : f32
    %156 = vector.broadcast %cst_56 : f32 to vector<16x16xf32>
    %157 = arith.select %76, %155, %156 : vector<16x16xi1>, vector<16x16xf32>
    %cst_57 = arith.constant dense<0xFF800000> : vector<16xf32>
    %158 = vector.multi_reduction <maximumf>, %157, %cst_57 [1] : vector<16x16xf32> to vector<16xf32>
    %159 = vector.shape_cast %158 : vector<16xf32> to vector<16x1xf32>
    %160 = vector.broadcast %159 : vector<16x1xf32> to vector<16x16xf32>
    %161 = arith.subf %157, %160 : vector<16x16xf32>
    %162 = math.exp %161 : vector<16x16xf32>
    %cst_58 = arith.constant dense<0.000000e+00> : vector<16xf32>
    %163 = vector.multi_reduction <add>, %162, %cst_58 [1] : vector<16x16xf32> to vector<16xf32>
    %164 = vector.shape_cast %163 : vector<16xf32> to vector<16x1xf32>
    %165 = tpu.reciprocal %164 {approx = true} : vector<16x1xf32> -> vector<16x1xf32>
    %166 = vector.broadcast %165 : vector<16x1xf32> to vector<16x16xf32>
    %167 = arith.mulf %162, %166 : vector<16x16xf32>
    %168 = arith.truncf %167 : vector<16x16xf32> to vector<16x16xbf16>
    %cst_59 = arith.constant dense<0.000000e+00> : vector<16x8xf32>
    %169 = tpu.matmul %168, %152, %cst_59 {dimension_numbers = #tpu.dot_dimension_numbers<[1], [0], [0], [1], [0, 0, 1, 1], [], []>} : vector<16x16xbf16>, vector<16x8xbf16>, vector<16x8xf32> -> vector<16x8xf32>
    %c136 = arith.constant 136 : index
    %c0_60 = arith.constant 0 : index
    %170 = vector.load %arg3[%c136, %c0_60] : memref<336x128xbf16, #tpu.memory_space<vmem>>, vector<8x32xbf16>
    %171 = arith.truncf %169 : vector<16x8xf32> to vector<16x8xbf16>
    %cst_61 = arith.constant dense<0.000000e+00> : vector<16x32xf32>
    %172 = tpu.matmul %171, %170, %cst_61 {dimension_numbers = #tpu.dot_dimension_numbers<[1], [0], [0], [1], [0, 0, 1, 1], [], []>} : vector<16x8xbf16>, vector<8x32xbf16>, vector<16x32xf32> -> vector<16x32xf32>
    %173 = arith.addf %149, %172 : vector<16x32xf32>
    %174 = arith.addf %41, %173 : vector<16x32xf32>
    %c6 = arith.constant 6 : index
    %c0_62 = arith.constant 0 : index
    %175 = vector.load %arg4[%c6, %c0_62] : memref<16x128xf32, #tpu.memory_space<vmem>>, vector<1x32xf32>
    %176 = vector.broadcast %175 : vector<1x32xf32> to vector<16x32xf32>
    %177 = arith.addf %174, %176 : vector<16x32xf32>
    %cst_63 = arith.constant dense<0.000000e+00> : vector<16xf32>
    %178 = vector.multi_reduction <add>, %177, %cst_63 [1] : vector<16x32xf32> to vector<16xf32>
    %179 = vector.shape_cast %178 : vector<16xf32> to vector<16x1xf32>
    %cst_64 = arith.constant 3.200000e+01 : f32
    %180 = vector.broadcast %cst_64 : f32 to vector<16x1xf32>
    %181 = arith.divf %179, %180 : vector<16x1xf32>
    %182 = vector.broadcast %181 : vector<16x1xf32> to vector<16x32xf32>
    %183 = arith.subf %177, %182 : vector<16x32xf32>
    %184 = arith.mulf %183, %183 : vector<16x32xf32>
    %cst_65 = arith.constant dense<0.000000e+00> : vector<16xf32>
    %185 = vector.multi_reduction <add>, %184, %cst_65 [1] : vector<16x32xf32> to vector<16xf32>
    %186 = vector.shape_cast %185 : vector<16xf32> to vector<16x1xf32>
    %cst_66 = arith.constant 3.200000e+01 : f32
    %187 = vector.broadcast %cst_66 : f32 to vector<16x1xf32>
    %188 = arith.divf %186, %187 : vector<16x1xf32>
    %cst_67 = arith.constant 9.99999974E-6 : f32
    %189 = vector.broadcast %cst_67 : f32 to vector<16x1xf32>
    %190 = arith.addf %188, %189 : vector<16x1xf32>
    %191 = math.rsqrt %190 : vector<16x1xf32>
    %192 = vector.broadcast %191 : vector<16x1xf32> to vector<16x32xf32>
    %193 = arith.mulf %183, %192 : vector<16x32xf32>
    %c7 = arith.constant 7 : index
    %c0_68 = arith.constant 0 : index
    %194 = vector.load %arg4[%c7, %c0_68] : memref<16x128xf32, #tpu.memory_space<vmem>>, vector<1x32xf32>
    %195 = vector.broadcast %194 : vector<1x32xf32> to vector<16x32xf32>
    %196 = arith.mulf %193, %195 : vector<16x32xf32>
    %c8 = arith.constant 8 : index
    %c0_69 = arith.constant 0 : index
    %197 = vector.load %arg4[%c8, %c0_69] : memref<16x128xf32, #tpu.memory_space<vmem>>, vector<1x32xf32>
    %198 = vector.broadcast %197 : vector<1x32xf32> to vector<16x32xf32>
    %199 = arith.addf %196, %198 : vector<16x32xf32>
    %200 = arith.truncf %199 : vector<16x32xf32> to vector<16x32xbf16>
    %c144 = arith.constant 144 : index
    %c0_70 = arith.constant 0 : index
    %201 = vector.load %arg3[%c144, %c0_70] : memref<336x128xbf16, #tpu.memory_space<vmem>>, vector<32x128xbf16>
    %cst_71 = arith.constant dense<0.000000e+00> : vector<16x128xf32>
    %202 = tpu.matmul %200, %201, %cst_71 {dimension_numbers = #tpu.dot_dimension_numbers<[1], [0], [0], [1], [0, 0, 1, 1], [], []>} : vector<16x32xbf16>, vector<32x128xbf16>, vector<16x128xf32> -> vector<16x128xf32>
    %c9 = arith.constant 9 : index
    %c0_72 = arith.constant 0 : index
    %203 = vector.load %arg4[%c9, %c0_72] : memref<16x128xf32, #tpu.memory_space<vmem>>, vector<1x128xf32>
    %204 = vector.broadcast %203 : vector<1x128xf32> to vector<16x128xf32>
    %205 = arith.addf %202, %204 : vector<16x128xf32>
    %206 = arith.mulf %205, %205 : vector<16x128xf32>
    %207 = arith.mulf %205, %206 : vector<16x128xf32>
    %cst_73 = arith.constant 4.471500e-02 : f32
    %208 = vector.broadcast %cst_73 : f32 to vector<16x128xf32>
    %209 = arith.mulf %208, %207 : vector<16x128xf32>
    %210 = arith.addf %205, %209 : vector<16x128xf32>
    %cst_74 = arith.constant 0.797884583 : f32
    %211 = vector.broadcast %cst_74 : f32 to vector<16x128xf32>
    %212 = arith.mulf %211, %210 : vector<16x128xf32>
    %213 = math.tanh %212 : vector<16x128xf32>
    %cst_75 = arith.constant 1.000000e+00 : f32
    %214 = vector.broadcast %cst_75 : f32 to vector<16x128xf32>
    %215 = arith.addf %214, %213 : vector<16x128xf32>
    %cst_76 = arith.constant 5.000000e-01 : f32
    %216 = vector.broadcast %cst_76 : f32 to vector<16x128xf32>
    %217 = arith.mulf %216, %215 : vector<16x128xf32>
    %218 = arith.mulf %205, %217 : vector<16x128xf32>
    %219 = arith.truncf %218 : vector<16x128xf32> to vector<16x128xbf16>
    %c176 = arith.constant 176 : index
    %c0_77 = arith.constant 0 : index
    %220 = vector.load %arg3[%c176, %c0_77] : memref<336x128xbf16, #tpu.memory_space<vmem>>, vector<128x32xbf16>
    %cst_78 = arith.constant dense<0.000000e+00> : vector<16x32xf32>
    %221 = tpu.matmul %219, %220, %cst_78 {dimension_numbers = #tpu.dot_dimension_numbers<[1], [0], [0], [1], [0, 0, 1, 1], [], []>} : vector<16x128xbf16>, vector<128x32xbf16>, vector<16x32xf32> -> vector<16x32xf32>
    %222 = arith.addf %177, %221 : vector<16x32xf32>
    %c10 = arith.constant 10 : index
    %c0_79 = arith.constant 0 : index
    %223 = vector.load %arg4[%c10, %c0_79] : memref<16x128xf32, #tpu.memory_space<vmem>>, vector<1x32xf32>
    %224 = vector.broadcast %223 : vector<1x32xf32> to vector<16x32xf32>
    %225 = arith.addf %222, %224 : vector<16x32xf32>
    %cst_80 = arith.constant dense<0.000000e+00> : vector<16xf32>
    %226 = vector.multi_reduction <add>, %225, %cst_80 [1] : vector<16x32xf32> to vector<16xf32>
    %227 = vector.shape_cast %226 : vector<16xf32> to vector<16x1xf32>
    %cst_81 = arith.constant 3.200000e+01 : f32
    %228 = vector.broadcast %cst_81 : f32 to vector<16x1xf32>
    %229 = arith.divf %227, %228 : vector<16x1xf32>
    %230 = vector.broadcast %229 : vector<16x1xf32> to vector<16x32xf32>
    %231 = arith.subf %225, %230 : vector<16x32xf32>
    %232 = arith.mulf %231, %231 : vector<16x32xf32>
    %cst_82 = arith.constant dense<0.000000e+00> : vector<16xf32>
    %233 = vector.multi_reduction <add>, %232, %cst_82 [1] : vector<16x32xf32> to vector<16xf32>
    %234 = vector.shape_cast %233 : vector<16xf32> to vector<16x1xf32>
    %cst_83 = arith.constant 3.200000e+01 : f32
    %235 = vector.broadcast %cst_83 : f32 to vector<16x1xf32>
    %236 = arith.divf %234, %235 : vector<16x1xf32>
    %cst_84 = arith.constant 9.99999974E-6 : f32
    %237 = vector.broadcast %cst_84 : f32 to vector<16x1xf32>
    %238 = arith.addf %236, %237 : vector<16x1xf32>
    %239 = math.rsqrt %238 : vector<16x1xf32>
    %240 = vector.broadcast %239 : vector<16x1xf32> to vector<16x32xf32>
    %241 = arith.mulf %231, %240 : vector<16x32xf32>
    %c11 = arith.constant 11 : index
    %c0_85 = arith.constant 0 : index
    %242 = vector.load %arg4[%c11, %c0_85] : memref<16x128xf32, #tpu.memory_space<vmem>>, vector<1x32xf32>
    %243 = vector.broadcast %242 : vector<1x32xf32> to vector<16x32xf32>
    %244 = arith.mulf %241, %243 : vector<16x32xf32>
    %c12 = arith.constant 12 : index
    %c0_86 = arith.constant 0 : index
    %245 = vector.load %arg4[%c12, %c0_86] : memref<16x128xf32, #tpu.memory_space<vmem>>, vector<1x32xf32>
    %246 = vector.broadcast %245 : vector<1x32xf32> to vector<16x32xf32>
    %247 = arith.addf %244, %246 : vector<16x32xf32>
    %248 = arith.truncf %247 : vector<16x32xf32> to vector<16x32xbf16>
    %c304 = arith.constant 304 : index
    %c0_87 = arith.constant 0 : index
    %249 = vector.load %arg3[%c304, %c0_87] : memref<336x128xbf16, #tpu.memory_space<vmem>>, vector<32x128xbf16>
    %cst_88 = arith.constant dense<0.000000e+00> : vector<16x128xf32>
    %250 = tpu.matmul %248, %249, %cst_88 {dimension_numbers = #tpu.dot_dimension_numbers<[1], [0], [0], [1], [0, 0, 1, 1], [], []>} : vector<16x32xbf16>, vector<32x128xbf16>, vector<16x128xf32> -> vector<16x128xf32>
    %c13 = arith.constant 13 : index
    %c0_89 = arith.constant 0 : index
    %251 = vector.load %arg4[%c13, %c0_89] : memref<16x128xf32, #tpu.memory_space<vmem>>, vector<1x128xf32>
    %252 = vector.broadcast %251 : vector<1x128xf32> to vector<16x128xf32>
    %253 = arith.addf %250, %252 : vector<16x128xf32>
    %254 = tpu.iota {dimensions = array<i32: 1>} : vector<16x128xi32>
    %c64_i32 = arith.constant 64 : i32
    %255 = vector.broadcast %c64_i32 : i32 to vector<16x128xi32>
    %256 = arith.cmpi slt, %254, %255 : vector<16x128xi32>
    %cst_90 = arith.constant -1.000000e+30 : f32
    %257 = vector.broadcast %cst_90 : f32 to vector<16x128xf32>
    %258 = arith.select %256, %253, %257 : vector<16x128xi1>, vector<16x128xf32>
    %cst_91 = arith.constant dense<0xFF800000> : vector<16xf32>
    %259 = vector.multi_reduction <maximumf>, %258, %cst_91 [1] : vector<16x128xf32> to vector<16xf32>
    %260 = vector.shape_cast %259 : vector<16xf32> to vector<16x1xf32>
    %261 = vector.broadcast %260 : vector<16x1xf32> to vector<16x128xf32>
    %262 = arith.subf %258, %261 : vector<16x128xf32>
    %263 = math.exp %262 : vector<16x128xf32>
    %cst_92 = arith.constant dense<0.000000e+00> : vector<16xf32>
    %264 = vector.multi_reduction <add>, %263, %cst_92 [1] : vector<16x128xf32> to vector<16xf32>
    %265 = vector.shape_cast %264 : vector<16xf32> to vector<16x1xf32>
    %266 = math.log %265 : vector<16x1xf32>
    %267 = arith.addf %266, %260 : vector<16x1xf32>
    %268 = vector.broadcast %31 : vector<16x1xi32> to vector<16x128xi32>
    %269 = arith.cmpi eq, %254, %268 : vector<16x128xi32>
    %270 = arith.extui %269 : vector<16x128xi1> to vector<16x128xi32>
    %271 = arith.sitofp %270 : vector<16x128xi32> to vector<16x128xf32>
    %272 = arith.mulf %271, %258 : vector<16x128xf32>
    %cst_93 = arith.constant dense<0.000000e+00> : vector<16xf32>
    %273 = vector.multi_reduction <add>, %272, %cst_93 [1] : vector<16x128xf32> to vector<16xf32>
    %274 = vector.shape_cast %273 : vector<16xf32> to vector<16x1xf32>
    %c8_i32 = arith.constant 8 : i32
    %275 = vector.broadcast %c8_i32 : i32 to vector<16x1xi32>
    %276 = arith.cmpi slt, %32, %275 : vector<16x1xi32>
    %277 = arith.subf %267, %274 : vector<16x1xf32>
    %cst_94 = arith.constant 0.000000e+00 : f32
    %278 = vector.broadcast %cst_94 : f32 to vector<16x1xf32>
    %279 = arith.select %276, %277, %278 : vector<16x1xi1>, vector<16x1xf32>
    %c64_i32_95 = arith.constant 64 : i32
    %280 = vector.broadcast %c64_i32_95 : i32 to vector<16x128xi32>
    %281 = arith.cmpi eq, %254, %280 : vector<16x128xi32>
    %282 = vector.shape_cast %279 : vector<16x1xf32> to vector<16x1xf32>
    %283 = vector.broadcast %282 : vector<16x1xf32> to vector<16x128xf32>
    %284 = arith.select %281, %283, %253 : vector<16x128xi1>, vector<16x128xf32>
    %c0_96 = arith.constant 0 : index
    %c0_97 = arith.constant 0 : index
    %c0_98 = arith.constant 0 : index
    %285 = vector.load %arg5[%c0_96, %c0_97, %c0_98] : memref<1x16x128xf32, #tpu.memory_space<vmem>>, vector<1x16x128xf32>
    %286 = vector.shape_cast %285 : vector<1x16x128xf32> to vector<16x128xf32>
    %287 = vector.shape_cast %284 : vector<16x128xf32> to vector<1x16x128xf32>
    tpu.vector_store %arg5[%c0_96, %c0_97, %c0_98], %287 {strides = array<i32>} : memref<1x16x128xf32, #tpu.memory_space<vmem>>, vector<1x16x128xf32>,
    return
  }
  func.func @transform_0(%arg0: i32) -> (i32, i32, i32) {
    %c0_i32 = arith.constant 0 : i32
    %c0_i32_0 = arith.constant 0 : i32
    %c0_i32_1 = arith.constant 0 : i32
    return %arg0, %c0_i32, %c0_i32_0 : i32, i32, i32
  }
  func.func @transform_1(%arg0: i32) -> (i32, i32, i32) {
    %c0_i32 = arith.constant 0 : i32
    %c0_i32_0 = arith.constant 0 : i32
    %c0_i32_1 = arith.constant 0 : i32
    return %arg0, %c0_i32, %c0_i32_0 : i32, i32, i32
  }
  func.func @transform_2(%arg0: i32) -> (i32, i32) {
    %c0_i32 = arith.constant 0 : i32
    %c0_i32_0 = arith.constant 0 : i32
    %c0_i32_1 = arith.constant 0 : i32
    return %c0_i32, %c0_i32_0 : i32, i32
  }
  func.func @transform_3(%arg0: i32) -> (i32, i32) {
    %c0_i32 = arith.constant 0 : i32
    %c0_i32_0 = arith.constant 0 : i32
    %c0_i32_1 = arith.constant 0 : i32
    return %c0_i32, %c0_i32_0 : i32, i32
  }
  func.func @transform_4(%arg0: i32) -> (i32, i32, i32) {
    %c0_i32 = arith.constant 0 : i32
    %c0_i32_0 = arith.constant 0 : i32
    %c0_i32_1 = arith.constant 0 : i32
    return %arg0, %c0_i32, %c0_i32_0 : i32, i32, i32
  }
}

</mosaic_0001>

<bundles_post_ra>
// kernel: chest_xray_report_generator.1
= control target key start
LH: loop header
LB: loop body
LE: loop exit
PB: predicated region body
PF: predicated region fallthrough
CT: control target
= control target key end

     0   :  { %s2304_s15 = smov 0   ;;  %s2664_s0 = inlined_call_operand.vmem [shape: bf16[2,64,32], index: 0, kind: input, shape index: {}]   ;;  %s2665_s1 = inlined_call_operand.vmem [shape: f32[2,16,128], index: 1, kind: input, shape index: {}]   ;;  %s2666_s2 = inlined_call_operand.vmem [shape: bf16[336,128], index: 2, kind: input, shape index: {}]   ;;  %s2667_s3 = inlined_call_operand.vmem [shape: f32[16,128], index: 3, kind: input, shape index: {}]   ;;  %s2668_s4 = inlined_call_operand.vmem [shape: f32[2,16,128], index: 4, kind: output, shape index: {}]  }
   0x1 LB: > { %s1847_s16 = sadd.s32 4294967295, %s2263_s15   ;;  %p1851_p0 = scmp.ge.s32.totalorder %s2263_s15, 1  ;;  %s2263_s15 = sphi %s2304_s15, %s14_s15  }
   0x2   : > { %p172_p1 = scmp.lt.s32.totalorder %s2263_s15, 3 }
   0x4   : > { %p173_p2 = pnand %p1851_p0, %p172_p1 }
   0x5   : > { %v2150_v0 = vld [vmem:[%s2666_s2] sm:$0xff] (!%p173_p2)   ;;  %p203_p3 = scmp.lt.s32.totalorder (!%p173_p2), %s1847_s16, 1  ;;  %v2151_v1 = vld [vmem:[%s2666_s2 + $0x8] sm:$0xff] (!%p173_p2)   ;;  %vm268_vm0 = vcmask (!%p173_p2), 261120   ;;  %v2156_v6 = vld [vmem:[%s2666_s2 + $0x10] sm:$0xff] (!%p173_p2)   ;;  %v2265_v7 = vmov (!%p173_p2), 0.0  }
   0x6   : > { %176 = sbr.rel (%p173_p2) target bundleno = 5298 (0x14b2), region = 36  ;;  %1982 = vmatprep.subr.bf16.mxu0 (!%p173_p2), %v2150_v0  ;;  %1994 = vmatprep.subr.bf16.mxu1 (!%p173_p2), %v2265_v7  ;;  %vm2266_vm1 = vmmov (!%p173_p2), 0   ;;  %v2157_v8 = vld [vmem:[%s2666_s2 + $0x18] sm:$0xff] (!%p173_p2)   ;;  %v2158_v9 = vld [vmem:[%s2666_s2 + $0x20] sm:$0xff] (!%p173_p2)   ;;  %vm402_vm2 = vcmask (!%p173_p2), 130048   ;;  %s2267_s27 = smov (!%p173_p2), 88  }
   0x7   : > { %1983 = vmatpush3.bf16.msra.mxu0 (!%p173_p2), %v2150_v0  ;;  %1996 = vmatprep.mubr.msk.bf16.mxu1 (!%p173_p2), %vm2266_vm1, %v2265_v7  ;;  %v1858_v10 = vld [vmem:[%s2667_s3] ss:$0 sm:$0xff] (!%p173_p2)  ;;  %s2268_s28 = smov (!%p173_p2), 96   ;;  %s2269_s29 = smov (!%p173_p2), 120   ;;  %vm676_vm4 = vcmask (!%p173_p2), 64512   ;;  %vm930_vm7 = vcmask (!%p173_p2), 1043456  }
   0x8   : > { %1984 = vmatprep.subr.bf16.mxu0 (!%p173_p2), %v2151_v1  ;;  %1995 = vmatpush3.bf16.msra.mxu1 (!%p173_p2), %v2156_v6  ;;  %s2270_s30 = smov (!%p173_p2), 64   ;;  %s2271_s5 = smov (!%p173_p2), 80  }
   0x9   : > { %2008 = vmatprep.subr.bf16.mxu1 (!%p173_p2), %v2265_v7  ;;  %s2272_s6 = smov (!%p173_p2), 112   ;;  %s2273_s7 = smov (!%p173_p2), 56  }
   0xa   : > { %s2274_s13 = smov (!%p173_p2), 48   ;;  %s2276_s17 = smov (!%p173_p2), 72  }
   0xb   : > { %1985 = vmatpush3.bf16.msra.mxu0 (!%p173_p2), %v2151_v1  ;;  %s2277_s20 = smov (!%p173_p2), 40  }
   0xc   : > { %2000 = vmatprep.subr.bf16.mxu0 (!%p173_p2), %v2265_v7 }
   0xd   : > { %s2670_s16 = smov (!%p203_p3, %s1847_s16), 1 }
   0xe   : > { %s1926_s21 = sshll.u32 %s2670_s16, 5  ;;  %s1927_s9 = sshll.u32 %s2670_s16, 4 }
   0xf   : > { %s207_s24 = scalar_lea.vmem %s2664_s0, %s1926_s21  ;;  %s212_s14 = scalar_lea.vmem %s2665_s1, %s1927_s9 }
  0x10   : > { %v2152_v2 = vld [vmem:[%s207_s24] sm:$0xff]   ;;  %v2153_v3 = vld [vmem:[%s207_s24 + $0x8] sm:$0xff]   ;;  %v2154_v4 = vld [vmem:[%s207_s24 + $0x10] sm:$0xff]   ;;  %s217_s19 = scalar_lea.vmem %s2668_s4, %s1927_s9 }
  0x11   : > { %1986 = vmatprep.mubr.msk.bf16.mxu0 %vm268_vm0, %v2152_v2  ;;  %v2155_v5 = vld [vmem:[%s207_s24 + $0x18] sm:$0xff]  }
  0x12   : > { %1987 = vmatmul.mubr.msk.bf16.vlgmr.msra.gmra.mrb[0].mxu0 %vm268_vm0, %v2153_v3 }
  0x13   : > { %1990 = vmatprep.mubr.msk.bf16.mxu0 %vm268_vm0, %v2154_v4  ;;  %2001 = vmatpush3.bf16.msra.mxu0 %v2157_v8 }
  0x14   : > { %2002 = vmatprep.subr.bf16.mxu0 %v2265_v7 }
  0x17   : > { %2003 = vmatpush3.bf16.msra.mxu0 %v2158_v9 }
  0x18   : > { %2016 = vmatprep.subr.bf16.mxu0 %v2265_v7 }
  0x1a   : > { %1991 = vmatmul.mubr.msk.bf16.gmra.mrb[4].mxu0 %vm268_vm0, %v2155_v5 }
  0x1b   : > { %2004 = vmatprep.mubr.msk.bf16.mxu0 %vm2266_vm1, %v2265_v7 }
  0xe5   : > { %v1988_v11 = vpop.f32.mrb[0].mxu0 }
  0xe6   : > { %v324_v12 = vadd.f32 %v1988_v11, %v1858_v10  ;;  %v315_v13 = vpop.f32.mrb[1].mxu0 }
  0xe7   : > { %v316_v14 = vadd.f32 %v1858_v10, %v315_v13  ;;  %v1989_v15 = vpop.f32.mrb[2].mxu0 }
  0xe8   : > { %v1871_v16 = vmul.f32 -1.442695, %v324_v12  ;;  %v327_v17 = vadd.f32 %v1989_v15, %v1858_v10  ;;  %v318_v18 = vpop.f32.mrb[3].mxu0 }
  0xe9   : > { %v1869_v19 = vmul.f32 -1.442695, %v316_v14  ;;  %v319_v20 = vadd.f32 %v1858_v10, %v318_v18 }
  0xea   : > { %2173 = vpow2.f32 %v1871_v16  ;;  %v1872_v21 = vmul.f32 -1.442695, %v327_v17 }
  0xeb   : > { %2175 = vpow2.f32 %v1869_v19  ;;  %v1870_v22 = vmul.f32 -1.442695, %v319_v20 }
  0xec   : > { %2177 = vpow2.f32 %v1872_v21 }
  0xed   : > { %2179 = vpow2.f32 %v1870_v22  ;;  %v1992_v23 = vpop.f32.mrb[4].mxu0 }
  0xee   : > { %v340_v24 = vadd.f32 %v1992_v23, %v1858_v10  ;;  %v331_v25 = vpop.f32.mrb[5].mxu0 }
  0xef   : > { %v332_v26 = vadd.f32 %v1858_v10, %v331_v25  ;;  %v1993_v27 = vpop.f32.mrb[6].mxu0 }
  0xf0   : > { %v1875_v28 = vmul.f32 -1.442695, %v340_v24  ;;  %v343_v29 = vadd.f32 %v1993_v27, %v1858_v10  ;;  %v334_v30 = vpop.f32.mrb[7].mxu0  ;;  %v429_v27 = vld [vmem:[%s2667_s3 + $0x1] sm:$0x1] }
  0xf1   : > { %v1873_v31 = vmul.f32 -1.442695, %v332_v26  ;;  %v335_v32 = vadd.f32 %v1858_v10, %v334_v30 }
  0xf2   : > { %2181 = vpow2.f32 %v1875_v28  ;;  %v1876_v33 = vmul.f32 -1.442695, %v343_v29 }
  0xf3   : > { %2183 = vpow2.f32 %v1873_v31  ;;  %v1874_v34 = vmul.f32 -1.442695, %v335_v32 }
  0xf4   : > { %v2174_v35 = vpop.eup %2173  ;;  %2185 = vpow2.f32 %v1876_v33 }
  0xf5   : > { %v2176_v36 = vpop.eup %2175  ;;  %v372_v37 = vadd.f32 1.0, %v2174_v35  ;;  %2187 = vpow2.f32 %v1874_v34  ;;  %v544_v34 = vlaneseq }
  0xf6   : > { %v2178_v38 = vpop.eup %2177  ;;  %v370_v39 = vadd.f32 1.0, %v2176_v36  ;;  %v484_v36 = vld [vmem:[%s2667_s3 + $0x2] sm:$0x1] }
  0xf7   : > { %v2180_v40 = vpop.eup %2179  ;;  %2189 = vrcp.f32 %v372_v37  ;;  %v373_v41 = vadd.f32 1.0, %v2178_v38  ;;  %v2367_v35 = vshrl.u32 %v544_v34, 7 }
  0xf8   : > { %2191 = vrcp.f32 %v370_v39  ;;  %v371_v42 = vadd.f32 1.0, %v2180_v40 }
  0xf9   : > { %2193 = vrcp.f32 %v373_v41  ;;  %v555_v37 = vsub.s32 0, %v2367_v35  ;;  %vm547_vm3 = vcmp.eq.s32.totalorder %v2367_v35, 0 }
  0xfa   : > { %2195 = vrcp.f32 %v371_v42 }
  0xfc   : > { %v2182_v43 = vpop.eup %2181 }
  0xfd   : > { %v2184_v44 = vpop.eup %2183  ;;  %v376_v45 = vadd.f32 1.0, %v2182_v43 }
  0xfe   : > { %v2186_v46 = vpop.eup %2185  ;;  %v374_v47 = vadd.f32 1.0, %v2184_v44  ;;  %v2380_v44 = vld [vmem:[%s212_s14] sm:$0xff] }
  0xff   : > { %v2188_v48 = vpop.eup %2187  ;;  %2197 = vrcp.f32 %v376_v45  ;;  %v377_v49 = vadd.f32 1.0, %v2186_v46 }
 0x100   : > { %2199 = vrcp.f32 %v374_v47  ;;  %v375_v50 = vadd.f32 1.0, %v2188_v48  ;;  %v2385_v47 = vld [vmem:[%s212_s14 + $0x8] sm:$0xff]  ;;  %s2275_s14 = smov 104  }
 0x101   : > { %v2190_v51 = vpop.eup %2189  ;;  %2201 = vrcp.f32 %v377_v49  ;;  %v564_v49 = vsel %vm268_vm0, %v2385_v47, 0.0 }
 0x102   : > { %v2192_v52 = vpop.eup %2191  ;;  %2203 = vrcp.f32 %v375_v50  ;;  %v396_v56 = vmul.f32 %v2190_v51, %v324_v12 }
 0x103   : > { %v2194_v53 = vpop.eup %2193  ;;  %v394_v54 = vmul.f32 %v2192_v52, %v316_v14 }
 0x104   : > { %v2196_v55 = vpop.eup %2195  ;;  %v397_v59 = vmul.f32 %v2194_v53, %v327_v17  ;;  %v406_v63 = vsel %vm402_vm2, %v396_v56, 0.0 }
 0x105   : > { %v395_v57 = vmul.f32 %v2196_v55, %v319_v20  ;;  %v403_v58 = vsel %vm402_vm2, %v394_v54, 0.0 }
 0x106   : > { %v408_v3 = vsel %vm402_vm2, %v397_v59, 0.0 }
 0x107   : > { %v404_v60 = vsel %vm402_vm2, %v395_v57, 0.0 }
 0x108   : > { %v405_v61 = vadd.f32 %v404_v60, %v403_v58  ;;  %v2159_v60 = vld [vmem:[%s2666_s2 + $0x28] sm:$0xff]  }
 0x109   : > { %v2198_v62 = vpop.eup %2197 }
 0x10a   : > { %v2200_v0 = vpop.eup %2199  ;;  %v407_v1 = vadd.f32 %v406_v63, %v405_v61  ;;  %v400_v8 = vmul.f32 %v2198_v62, %v340_v24  ;;  %v2160_v61 = vld [vmem:[%s2666_s2 + $0x30] sm:$0xff]  }
 0x10b   : > { %v2202_v2 = vpop.eup %2201  ;;  %v398_v4 = vmul.f32 %v2200_v0, %v332_v26 }
 0x10c   : > { %v2204_v5 = vpop.eup %2203  ;;  %v409_v6 = vadd.f32 %v408_v3, %v407_v1  ;;  %v401_v12 = vmul.f32 %v2202_v2, %v343_v29  ;;  %v414_v15 = vsel %vm402_vm2, %v400_v8, 0.0 }
 0x10d   : > { %v410_v9 = vsel %vm402_vm2, %v398_v4, 0.0  ;;  %v399_v10 = vmul.f32 %v2204_v5, %v335_v32 }
 0x10e   : > { %v411_v11 = vadd.f32 %v410_v9, %v409_v6  ;;  %v416_v17 = vsel %vm402_vm2, %v401_v12, 0.0  ;;  %v1882_v6 = vld [vmem:[%s2667_s3 + $0x3] ss:$0 sm:$0xff] }
 0x10f   : > { %v412_v13 = vsel %vm402_vm2, %v399_v10, 0.0 }
 0x110   : > { %v413_v14 = vadd.f32 %v412_v13, %v411_v11  ;;  %v1883_v11 = vld [vmem:[%s2667_s3 + $0x4] ss:$0 sm:$0xff] }
 0x112   : > { %v415_v16 = vadd.f32 %v414_v15, %v413_v14 }
 0x114   : > { %v417_v18 = vadd.f32 %v416_v17, %v415_v16  ;;  %v1884_v16 = vld [vmem:[%s2667_s3 + $0x5] ss:$0 sm:$0xff] }
 0x116   : > { %v418_v19 = vrot.slane %v417_v18, 4 }
 0x118   : > { %v419_v20 = vadd.f32 %v418_v19, %v417_v18 }
 0x11a   : > { %v420_v21 = vrot.slane %v419_v20, 2 }
 0x11c   : > { %v421_v22 = vadd.f32 %v420_v21, %v419_v20 }
 0x11e   : > { %v422_v23 = vrot.slane %v421_v22, 1 }
 0x120   : > { %v423_v24 = vadd.f32 %v422_v23, %v421_v22 }
 0x122   : > { %v425_v25 = vmul.f32 0.015625, %v423_v24 }
 0x124   : > { %v426_v26 = vpack.c.bf16 %v425_v25, %v425_v25 }
 0x126   : > { %1997 = vmatmul.mubr.msk.bf16.vlgmr.msra.gmra.mrb[0].mxu1 %vm402_vm2, %v426_v26 }
 0x127   : > { %2012 = vmatprep.mubr.msk.bf16.mxu1 %vm2266_vm1, %v2265_v7  ;;  %2009 = vmatpush3.bf16.msra.mxu1 %v2159_v60 }
 0x128   : > { %2010 = vmatprep.subr.bf16.mxu1 %v2265_v7 }
 0x12b   : > { %2011 = vmatpush3.bf16.msra.mxu1 %v2160_v61 }
 0x12c   : > { %2022 = vmatprep.subr.bf16.mxu1 %v2265_v7 }
 0x1f9   : > { %v473_v28 = vpop.f32.mrb[0].mxu1 }
 0x1fa   : > { %v474_v29 = vadd.f32 %v473_v28, %v429_v27  ;;  %v1998_v30 = vpop.f32.mrb[1].mxu1 }
 0x1fb   : > { %v476_v31 = vpop.f32.mrb[2].mxu1  ;;  %v2435_v30 = vadd.s32 8, %v2367_v35 }
 0x1fc   : > { %v479_v32 = vpack.c.bf16 %v474_v29, %v474_v29  ;;  %v1999_v33 = vpop.f32.mrb[3].mxu1  ;;  %v2432_v29 = vand.u32 127, %v544_v34 }
 0x1fe   : > { %2005 = vmatmul.mubr.msk.bf16.vlgmr.msra.gmra.mrb[8].mxu0 %vm268_vm0, %v479_v32  ;;  %vm671_vm5 = vcmp.le.s32.totalorder %v2432_v29, %v2367_v35  ;;  %vm672_vm6 = vcmp.le.s32.totalorder %v2432_v29, %v2435_v30  ;;  %v1323_v30 = vld [vmem:[%s2666_s2 + $0x44] sm:$0xf]  ;;  %vm1728_vm8 = vcmp.lt.s32.totalorder %v2432_v29, 64  ;;  %vm1775_vm9 = vcmp.eq.s32.totalorder %v2432_v29, 64 }
 0x1ff   : > { %2018 = vmatprep.mubr.msk.bf16.mxu0 %vm2266_vm1, %v2265_v7 }
 0x2d1   : > { %v534_v38 = vpop.f32.mrb[8].mxu0 }
 0x2d2   : > { %v535_v39 = vadd.f32 %v534_v38, %v484_v36  ;;  %v2006_v40 = vpop.f32.mrb[9].mxu0 }
 0x2d3   : > { %v537_v41 = vpop.f32.mrb[10].mxu0 }
 0x2d4   : > { %v556_v42 = vrot.slane %v535_v39, %v555_v37  ;;  %v2007_v43 = vpop.f32.mrb[11].mxu0 }
 0x2d6   : > { %v557_v45 = vsel %vm547_vm3, %v556_v42, 0.0 }
 0x2d7   : > { %v2383_v46 = vadd.f32 %v557_v45, %v2380_v44 }
 0x2d9   : > { %v561_v48 = vsel %vm268_vm0, %v2383_v46, 0.0 }
 0x2da   : > { %562 = vadd.xlane.f32.xlu0 %v561_v48 }
 0x2de   : > { %565 = vadd.xlane.f32.xlu0 %v564_v49 }
 0x367   : > { %v563_v50 = vpop.xlane.xlu0 %562 }
 0x368   : > { %v568_v51 = vmul.f32 0.03125, %v563_v50 }
 0x36a   : > { %v570_v52 = vsub.f32 %v2383_v46, %v568_v51 }
 0x36b   : > { %v566_v53 = vpop.xlane.xlu0 %565 }
 0x36c   : > { %v569_v54 = vmul.f32 0.03125, %v566_v53  ;;  %v572_v55 = vmul.f32 %v570_v52, %v570_v52 }
 0x36e   : > { %v571_v56 = vsub.f32 %v2385_v47, %v569_v54  ;;  %v574_v57 = vsel %vm268_vm0, %v572_v55, 0.0 }
 0x36f   : > { %575 = vadd.xlane.f32.xlu1 %v574_v57 }
 0x370   : > { %v573_v58 = vmul.f32 %v571_v56, %v571_v56 }
 0x372   : > { %v577_v59 = vsel %vm268_vm0, %v573_v58, 0.0 }
 0x373   : > { %578 = vadd.xlane.f32.xlu1 %v577_v59 }
 0x3fc   : > { %v576_v62 = vpop.xlane.xlu1 %575 }
 0x3fd   : > { %v580_v63 = vmul.f32 0.03125, %v576_v62 }
 0x3ff   : > { %v582_v0 = vadd.f32 1e-05, %v580_v63 }
 0x400   : > { %v579_v1 = vpop.xlane.xlu1 %578 }
 0x401   : > { %2205 = vrsqrt.f32 %v582_v0  ;;  %v581_v2 = vmul.f32 0.03125, %v579_v1 }
 0x403   : > { %v583_v3 = vadd.f32 1e-05, %v581_v2 }
 0x405   : > { %2207 = vrsqrt.f32 %v583_v3 }
 0x40b   : > { %v2206_v4 = vpop.eup %2205 }
 0x40c   : > { %v586_v5 = vmul.f32 %v2206_v4, %v570_v52 }
 0x40e   : > { %v593_v9 = vmul.f32 %v1882_v6, %v586_v5 }
 0x40f   : > { %v2208_v8 = vpop.eup %2207 }
 0x410   : > { %v587_v10 = vmul.f32 %v2208_v8, %v571_v56  ;;  %v600_v13 = vadd.f32 %v1883_v11, %v593_v9 }
 0x412   : > { %v594_v12 = vmul.f32 %v1882_v6, %v587_v10 }
 0x414   : > { %v601_v14 = vadd.f32 %v1883_v11, %v594_v12 }
 0x416   : > { %v602_v15 = vpack.c.bf16 %v601_v14, %v600_v13 }
 0x418   : > { %2013 = vmatmul.mubr.msk.bf16.vlgmr.msra.gmra.mrb[4].mxu1 %vm268_vm0, %v602_v15 }
 0x419   : > { %2024 = vmatprep.mubr.msk.bf16.mxu1 %vm2266_vm1, %v2265_v7 }
 0x4eb   : > { %v661_v17 = vpop.f32.mrb[4].mxu1 }
 0x4ec   : > { %v2014_v18 = vpop.f32.mrb[5].mxu1  ;;  %v662_v20 = vadd.f32 %v1884_v16, %v661_v17 }
 0x4ed   : > { %v664_v19 = vpop.f32.mrb[6].mxu1 }
 0x4ee   : > { %v665_v21 = vadd.f32 %v1884_v16, %v664_v19  ;;  %v2015_v22 = vpop.f32.mrb[7].mxu1 }
 0x4f0   : > { %v2415_v23 = vpack.c.bf16 %v665_v21, %v662_v20 }
 0x4f2   : > { %802 = vrot.lane.b32.xlu1 %v2415_v23, %s2267_s27  ;;  %674 = vrot.lane.b32.xlu0 %v2415_v23, %s2268_s28 }
 0x4f6   : > { %800 = vrot.lane.b32.xlu1 %v2415_v23, %s2269_s29 }
 0x564   : > { %v675_v24 = vpop.permute.xlu0 %674  ;;  %v803_v26 = vpop.permute.xlu1 %802 }
 0x565   : > { %v681_v25 = vsel %vm676_vm4, %v675_v24, 0  ;;  %v808_v27 = vsel %vm676_vm4, %v803_v26, 0 }
 0x566   : > { %2017 = vmatpush3.bf16.xpose.msra.mxu0 %v681_v25 }
 0x567   : > { %2028 = vmatprep.subr.bf16.mxu0 %v2265_v7 }
 0x568   : > { %v801_v28 = vpop.permute.xlu1 %800 }
 0x56d   : > { %2019 = vmatmul.mubr.msk.bf16.vlgmr.msra.gmra.mrb[12].mxu0 %vm676_vm4, %v2415_v23 }
 0x56e   : > { %2029 = vmatpush3.bf16.xpose.msra.mxu0 %v808_v27  ;;  %2030 = vmatprep.mubr.msk.bf16.mxu0 %vm2266_vm1, %v2265_v7 }
 0x56f   : > { %2040 = vmatprep.subr.bf16.mxu0 %v2265_v7 }
 0x575   : > { %2031 = vmatmul.mubr.msk.bf16.vlgmr.msra.gmra.mrb[16].mxu0 %vm676_vm4, %v801_v28 }
 0x576   : > { %2042 = vmatprep.mubr.msk.bf16.mxu0 %vm2266_vm1, %v2265_v7 }
 0x640   : > { %v717_v31 = vpop.f32.mrb[12].mxu0 }
 0x641   : > { %v724_v32 = vmul.f32 0.35355338, %v717_v31  ;;  %v2020_v33 = vpop.f32.mrb[13].mxu0  ;;  %v798_v31 = vld [vmem:[%s2666_s2 + $0x38] sm:$0xf] }
 0x642   : > { %v720_v36 = vpop.f32.mrb[14].mxu0  ;;  %v925_v33 = vld [vmem:[%s2666_s2 + $0x3c] sm:$0xf] }
 0x643   : > { %v725_v37 = vmul.f32 0.35355338, %v720_v36  ;;  %v2021_v38 = vpop.f32.mrb[15].mxu0  ;;  %v726_v34 = vsel %vm671_vm5, %v724_v32, -1e+30  ;;  %v979_v32 = vsel %vm930_vm7, %v798_v31, 0 }
 0x644   : > { %v728_v39 = vsel %vm402_vm2, %v726_v34, -inf  ;;  %v932_v36 = vsel %vm930_vm7, %v925_v33, 0  ;;  %v1147_v33 = vld [vmem:[%s2666_s2 + $0x40] sm:$0xf] }
 0x645   : > { %729 = vmax.xlane.f32.xlu1 %v728_v39  ;;  %v727_v40 = vsel %vm672_vm6, %v725_v37, -1e+30  ;;  %2041 = vmatpush3.bf16.msra.mxu0 %v932_v36  ;;  %v1153_v36 = vsel %vm930_vm7, %v1147_v33, 0 }
 0x646   : > { %v731_v41 = vsel %vm402_vm2, %v727_v40, -inf  ;;  %2052 = vmatprep.subr.bf16.mxu0 %v2265_v7 }
 0x647   : > { %732 = vmax.xlane.f32.xlu0 %v731_v41 }
 0x648   : > { %v844_v42 = vpop.f32.mrb[16].mxu0 }
 0x649   : > { %v851_v43 = vmul.f32 0.35355338, %v844_v42  ;;  %v2032_v45 = vpop.f32.mrb[17].mxu0 }
 0x64a   : > { %v847_v48 = vpop.f32.mrb[18].mxu0 }
 0x64b   : > { %v852_v49 = vmul.f32 0.35355338, %v847_v48  ;;  %v2033_v50 = vpop.f32.mrb[19].mxu0  ;;  %v853_v51 = vsel %vm671_vm5, %v851_v43, -1e+30 }
 0x64c   : > { %v855_v52 = vsel %vm402_vm2, %v853_v51, -inf }
 0x64d   : > { %856 = vmax.xlane.f32.xlu0 %v855_v52  ;;  %v854_v53 = vsel %vm672_vm6, %v852_v49, -1e+30 }
 0x64e   : > { %v858_v54 = vsel %vm402_vm2, %v854_v53, -inf }
 0x651   : > { %859 = vmax.xlane.f32.xlu0 %v858_v54 }
 0x6d2   : > { %v730_v55 = vpop.xlane.xlu1 %729 }
 0x6d3   : > { %v734_v56 = vsub.f32 %v726_v34, %v730_v55 }
 0x6d4   : > { %v733_v57 = vpop.xlane.xlu0 %732 }
 0x6d5   : > { %v736_v58 = vmul.f32 1.442695, %v734_v56  ;;  %v735_v59 = vsub.f32 %v727_v40, %v733_v57 }
 0x6d7   : > { %2209 = vpow2.f32 %v736_v58  ;;  %v738_v60 = vmul.f32 1.442695, %v735_v59 }
 0x6d9   : > { %2211 = vpow2.f32 %v738_v60 }
 0x6da   : > { %v857_v61 = vpop.xlane.xlu0 %856 }
 0x6db   : > { %v861_v62 = vsub.f32 %v853_v51, %v857_v61 }
 0x6dd   : > { %v863_v63 = vmul.f32 1.442695, %v861_v62 }
 0x6de   : > { %v860_v0 = vpop.xlane.xlu0 %859 }
 0x6df   : > { %2213 = vpow2.f32 %v863_v63  ;;  %v862_v1 = vsub.f32 %v854_v53, %v860_v0 }
 0x6e1   : > { %v2210_v2 = vpop.eup %2209  ;;  %v865_v3 = vmul.f32 1.442695, %v862_v1 }
 0x6e2   : > { %v740_v4 = vsel %vm402_vm2, %v2210_v2, 0.0 }
 0x6e3   : > { %v2212_v5 = vpop.eup %2211  ;;  %2215 = vpow2.f32 %v865_v3  ;;  %741 = vadd.xlane.f32.xlu1 %v740_v4 }
 0x6e4   : > { %v743_v6 = vsel %vm402_vm2, %v2212_v5, 0.0 }
 0x6e5   : > { %744 = vadd.xlane.f32.xlu0 %v743_v6 }
 0x6e9   : > { %v2214_v8 = vpop.eup %2213 }
 0x6ea   : > { %v867_v9 = vsel %vm402_vm2, %v2214_v8, 0.0 }
 0x6eb   : > { %868 = vadd.xlane.f32.xlu1 %v867_v9 }
 0x6ed   : > { %v2216_v10 = vpop.eup %2215 }
 0x6ee   : > { %v870_v11 = vsel %vm402_vm2, %v2216_v10, 0.0 }
 0x6ef   : > { %871 = vadd.xlane.f32.xlu0 %v870_v11 }
 0x6fc   : > { %751 = vrot.lane.b32.xlu1 %v2415_v23, %s2270_s30 }
 0x700   : > { %1024 = vrot.lane.b32.xlu1 %v2415_v23, %s2271_s5 }
 0x704   : > { %1022 = vrot.lane.b32.xlu1 %v2415_v23, %s2272_s6 }
 0x705   : > { %878 = vrot.lane.b32.xlu0 %v2415_v23, %s2273_s7 }
 0x770   : > { %v742_v12 = vpop.xlane.xlu1 %741 }
 0x771   : > { %2217 = vrcp.f32 %v742_v12 }
 0x772   : > { %v745_v13 = vpop.xlane.xlu0 %744 }
 0x773   : > { %2219 = vrcp.f32 %v745_v13 }
 0x778   : > { %v869_v14 = vpop.xlane.xlu1 %868 }
 0x779   : > { %2221 = vrcp.f32 %v869_v14 }
 0x77b   : > { %v2218_v15 = vpop.eup %2217 }
 0x77c   : > { %v752_v16 = vpop.permute.xlu1 %751  ;;  %v872_v17 = vpop.xlane.xlu0 %871  ;;  %v748_v19 = vmul.f32 %v2218_v15, %v2210_v2 }
 0x77d   : > { %v2220_v18 = vpop.eup %2219  ;;  %2223 = vrcp.f32 %v872_v17  ;;  %2023 = vmatpush3.bf16.msra.mxu1 %v752_v16 }
 0x77e   : > { %v749_v20 = vmul.f32 %v2220_v18, %v2212_v5  ;;  %2034 = vmatprep.subr.bf16.mxu1 %v2265_v7 }
 0x780   : > { %v879_v21 = vpop.permute.xlu0 %878  ;;  %v750_v22 = vpack.c.bf16 %v749_v20, %v748_v19  ;;  %v1025_v43 = vpop.permute.xlu1 %1024 }
 0x781   : > { %v1030_v50 = vsel %vm676_vm4, %v1025_v43, 0 }
 0x782   : > { %2025 = vmatmul.mubr.msk.bf16.vlgmr.msra.gmra.mrb[8].mxu1 %vm402_vm2, %v750_v22 }
 0x783   : > { %2035 = vmatpush3.bf16.msra.mxu1 %v879_v21  ;;  %2036 = vmatprep.mubr.msk.bf16.mxu1 %vm2266_vm1, %v2265_v7  ;;  %v2222_v24 = vpop.eup %2221 }
 0x784   : > { %2046 = vmatprep.subr.bf16.mxu1 %v2265_v7  ;;  %v875_v26 = vmul.f32 %v2222_v24, %v2214_v8  ;;  %v1023_v51 = vpop.permute.xlu1 %1022 }
 0x787   : > { %v2224_v25 = vpop.eup %2223 }
 0x788   : > { %v876_v27 = vmul.f32 %v2224_v25, %v2216_v10 }
 0x78a   : > { %v877_v28 = vpack.c.bf16 %v876_v27, %v875_v26 }
 0x78c   : > { %2037 = vmatmul.mubr.msk.bf16.vlgmr.msra.gmra.mrb[12].mxu1 %vm402_vm2, %v877_v28 }
 0x78d   : > { %2048 = vmatprep.mubr.msk.bf16.mxu1 %vm2266_vm1, %v2265_v7  ;;  %2047 = vmatpush3.bf16.msra.mxu1 %v979_v32 }
 0x78e   : > { %2058 = vmatprep.subr.bf16.mxu1 %v2265_v7 }
 0x855   : > { %v791_v37 = vpop.f32.mrb[8].mxu1 }
 0x856   : > { %v2026_v38 = vpop.f32.mrb[9].mxu1 }
 0x857   : > { %v794_v34 = vpop.f32.mrb[10].mxu1 }
 0x858   : > { %v799_v39 = vpack.c.bf16 %v794_v34, %v791_v37  ;;  %v2027_v40 = vpop.f32.mrb[11].mxu1 }
 0x85a   : > { %2049 = vmatmul.mubr.msk.bf16.vlgmr.msra.gmra.mrb[16].mxu1 %vm676_vm4, %v799_v39 }
 0x85b   : > { %2060 = vmatprep.mubr.msk.bf16.mxu1 %vm2266_vm1, %v2265_v7 }
 0x85f   : > { %v918_v41 = vpop.f32.mrb[12].mxu1 }
 0x860   : > { %v2038_v42 = vpop.f32.mrb[13].mxu1 }
 0x861   : > { %v921_v45 = vpop.f32.mrb[14].mxu1 }
 0x862   : > { %v926_v48 = vpack.c.bf16 %v921_v45, %v918_v41  ;;  %v2039_v49 = vpop.f32.mrb[15].mxu1 }
 0x864   : > { %2043 = vmatmul.mubr.msk.bf16.vlgmr.msra.gmra.mrb[20].mxu0 %vm676_vm4, %v926_v48 }
 0x865   : > { %2053 = vmatpush3.bf16.xpose.msra.mxu0 %v1030_v50  ;;  %2054 = vmatprep.mubr.msk.bf16.mxu0 %vm2266_vm1, %v2265_v7 }
 0x866   : > { %2064 = vmatprep.subr.bf16.mxu0 %v2265_v7 }
 0x86c   : > { %2055 = vmatmul.mubr.msk.bf16.vlgmr.msra.gmra.mrb[24].mxu0 %vm676_vm4, %v1023_v51 }
 0x86d   : > { %2066 = vmatprep.mubr.msk.bf16.mxu0 %vm2266_vm1, %v2265_v7  ;;  %2065 = vmatpush3.bf16.msra.mxu0 %v1153_v36 }
 0x86e   : > { %2076 = vmatprep.subr.bf16.mxu0 %v2265_v7 }
 0x92d   : > { %v1015_v52 = vpop.f32.mrb[16].mxu1 }
 0x92e   : > { %v2050_v53 = vpop.f32.mrb[17].mxu1 }
 0x92f   : > { %v1018_v54 = vpop.f32.mrb[18].mxu1 }
 0x930   : > { %v2051_v55 = vpop.f32.mrb[19].mxu1 }
 0x937   : > { %v968_v56 = vpop.f32.mrb[20].mxu0 }
 0x938   : > { %v2494_v57 = vadd.f32 %v1015_v52, %v968_v56  ;;  %v2044_v58 = vpop.f32.mrb[21].mxu0 }
 0x939   : > { %v971_v59 = vpop.f32.mrb[22].mxu0 }
 0x93a   : > { %v2496_v60 = vadd.f32 %v1018_v54, %v971_v59  ;;  %v2045_v61 = vpop.f32.mrb[23].mxu0 }
 0x93f   : > { %v1066_v62 = vpop.f32.mrb[24].mxu0 }
 0x940   : > { %v1073_v63 = vmul.f32 0.35355338, %v1066_v62  ;;  %v2056_v0 = vpop.f32.mrb[25].mxu0 }
 0x941   : > { %v1069_v1 = vpop.f32.mrb[26].mxu0 }
 0x942   : > { %v1074_v2 = vmul.f32 0.35355338, %v1069_v1  ;;  %v2057_v3 = vpop.f32.mrb[27].mxu0  ;;  %v1075_v4 = vsel %vm671_vm5, %v1073_v63, -1e+30  ;;  %v1329_v1 = vsel %vm930_vm7, %v1323_v30, 0 }
 0x943   : > { %v1077_v5 = vsel %vm402_vm2, %v1075_v4, -inf }
 0x944   : > { %1078 = vmax.xlane.f32.xlu1 %v1077_v5  ;;  %v1076_v6 = vsel %vm672_vm6, %v1074_v2, -1e+30 }
 0x945   : > { %v1080_v8 = vsel %vm402_vm2, %v1076_v6, -inf }
 0x946   : > { %1081 = vmax.xlane.f32.xlu0 %v1080_v8 }
 0x955   : > { %1100 = vrot.lane.b32.xlu1 %v2415_v23, %s2274_s13 }
 0x959   : > { %1198 = vrot.lane.b32.xlu1 %v2415_v23, %s2275_s14 }
 0x9d1   : > { %v1079_v9 = vpop.xlane.xlu1 %1078 }
 0x9d2   : > { %v1083_v10 = vsub.f32 %v1075_v4, %v1079_v9 }
 0x9d3   : > { %v1082_v11 = vpop.xlane.xlu0 %1081 }
 0x9d4   : > { %v1085_v12 = vmul.f32 1.442695, %v1083_v10  ;;  %v1084_v13 = vsub.f32 %v1076_v6, %v1082_v11 }
 0x9d5   : > { %v1101_v14 = vpop.permute.xlu1 %1100 }
 0x9d6   : > { %2225 = vpow2.f32 %v1085_v12  ;;  %v1087_v15 = vmul.f32 1.442695, %v1084_v13  ;;  %2059 = vmatpush3.bf16.msra.mxu1 %v1101_v14 }
 0x9d7   : > { %2070 = vmatprep.subr.bf16.mxu1 %v2265_v7 }
 0x9d8   : > { %2227 = vpow2.f32 %v1087_v15 }
 0x9d9   : > { %v1199_v32 = vpop.permute.xlu1 %1198 }
 0x9e0   : > { %v2226_v16 = vpop.eup %2225 }
 0x9e1   : > { %v1089_v17 = vsel %vm402_vm2, %v2226_v16, 0.0 }
 0x9e2   : > { %v2228_v18 = vpop.eup %2227  ;;  %1090 = vadd.xlane.f32.xlu0 %v1089_v17 }
 0x9e3   : > { %v1092_v19 = vsel %vm402_vm2, %v2228_v18, 0.0 }
 0x9e6   : > { %1093 = vadd.xlane.f32.xlu0 %v1092_v19 }
 0x9fc   : > { %1200 = vrot.lane.b32.xlu0 %v2415_v23, %s2276_s17 }
 0xa6f   : > { %v1091_v20 = vpop.xlane.xlu0 %1090 }
 0xa70   : > { %2229 = vrcp.f32 %v1091_v20 }
 0xa73   : > { %v1094_v21 = vpop.xlane.xlu0 %1093 }
 0xa74   : > { %2231 = vrcp.f32 %v1094_v21 }
 0xa77   : > { %v1201_v27 = vpop.permute.xlu0 %1200 }
 0xa78   : > { %v1206_v31 = vsel %vm676_vm4, %v1201_v27, 0 }
 0xa7a   : > { %v2230_v22 = vpop.eup %2229 }
 0xa7b   : > { %v1097_v25 = vmul.f32 %v2230_v22, %v2226_v16  ;;  %v1900_v22 = vld [vmem:[%s2667_s3 + $0x6] ss:$0 sm:$0xff] }
 0xa7e   : > { %v2232_v24 = vpop.eup %2231 }
 0xa7f   : > { %v1098_v26 = vmul.f32 %v2232_v24, %v2228_v18 }
 0xa81   : > { %v1099_v28 = vpack.c.bf16 %v1098_v26, %v1097_v25 }
 0xa83   : > { %2061 = vmatmul.mubr.msk.bf16.vlgmr.msra.gmra.mrb[20].mxu1 %vm402_vm2, %v1099_v28 }
 0xa84   : > { %2071 = vmatpush3.bf16.xpose.msra.mxu1 %v1206_v31  ;;  %2072 = vmatprep.mubr.msk.bf16.mxu1 %vm2266_vm1, %v2265_v7 }
 0xa85   : > { %2082 = vmatprep.subr.bf16.mxu1 %v2265_v7 }
 0xa8b   : > { %2073 = vmatmul.mubr.msk.bf16.vlgmr.msra.gmra.mrb[24].mxu1 %vm676_vm4, %v1199_v32 }
 0xa8c   : > { %2084 = vmatprep.mubr.msk.bf16.mxu1 %vm2266_vm1, %v2265_v7  ;;  %2083 = vmatpush3.bf16.msra.mxu1 %v1329_v1 }
 0xa8d   : > { %2096 = vmatprep.subr.bf16.mxu1 %v2265_v7 }
 0xb56   : > { %v1140_v37 = vpop.f32.mrb[20].mxu1 }
 0xb57   : > { %v2062_v38 = vpop.f32.mrb[21].mxu1 }
 0xb58   : > { %v1143_v34 = vpop.f32.mrb[22].mxu1 }
 0xb59   : > { %v1148_v39 = vpack.c.bf16 %v1143_v34, %v1140_v37  ;;  %v2063_v40 = vpop.f32.mrb[23].mxu1 }
 0xb5b   : > { %2067 = vmatmul.mubr.msk.bf16.vlgmr.msra.gmra.mrb[28].mxu0 %vm676_vm4, %v1148_v39 }
 0xb5c   : > { %2078 = vmatprep.mubr.msk.bf16.mxu0 %vm2266_vm1, %v2265_v7 }
 0xb5e   : > { %v1242_v41 = vpop.f32.mrb[24].mxu1 }
 0xb5f   : > { %v1249_v42 = vmul.f32 0.35355338, %v1242_v41  ;;  %v2074_v43 = vpop.f32.mrb[25].mxu1 }
 0xb60   : > { %v1245_v45 = vpop.f32.mrb[26].mxu1 }
 0xb61   : > { %v1250_v48 = vmul.f32 0.35355338, %v1245_v45  ;;  %v2075_v49 = vpop.f32.mrb[27].mxu1  ;;  %v1251_v50 = vsel %vm671_vm5, %v1249_v42, -1e+30  ;;  %v2161_v45 = vld [vmem:[%s2666_s2 + $0x48] sm:$0xff]  }
 0xb62   : > { %v1253_v51 = vsel %vm402_vm2, %v1251_v50, -inf }
 0xb63   : > { %1254 = vmax.xlane.f32.xlu1 %v1253_v51  ;;  %v1252_v52 = vsel %vm672_vm6, %v1250_v48, -1e+30  ;;  %v2162_v48 = vld [vmem:[%s2666_s2 + $0x50] sm:$0xff]  }
 0xb64   : > { %v1256_v53 = vsel %vm402_vm2, %v1252_v52, -inf }
 0xb65   : > { %1257 = vmax.xlane.f32.xlu0 %v1256_v53 }
 0xbf0   : > { %v1255_v54 = vpop.xlane.xlu1 %1254 }
 0xbf1   : > { %v1259_v55 = vsub.f32 %v1251_v50, %v1255_v54 }
 0xbf2   : > { %v1258_v56 = vpop.xlane.xlu0 %1257 }
 0xbf3   : > { %v1261_v58 = vmul.f32 1.442695, %v1259_v55  ;;  %v1260_v59 = vsub.f32 %v1252_v52, %v1258_v56 }
 0xbf5   : > { %2233 = vpow2.f32 %v1261_v58  ;;  %v1263_v61 = vmul.f32 1.442695, %v1260_v59  ;;  %v1901_v58 = vld [vmem:[%s2667_s3 + $0x7] ss:$0 sm:$0xff] }
 0xbf7   : > { %2235 = vpow2.f32 %v1263_v61 }
 0xbff   : > { %v2234_v35 = vpop.eup %2233 }
 0xc00   : > { %v1265_v62 = vsel %vm402_vm2, %v2234_v35, 0.0 }
 0xc01   : > { %v2236_v63 = vpop.eup %2235  ;;  %1266 = vadd.xlane.f32.xlu0 %v1265_v62  ;;  %v1902_v62 = vld [vmem:[%s2667_s3 + $0x8] ss:$0 sm:$0xff] }
 0xc02   : > { %v1268_v0 = vsel %vm402_vm2, %v2236_v63, 0.0 }
 0xc03   : > { %1269 = vadd.xlane.f32.xlu1 %v1268_v0 }
 0xc17   : > { %1276 = vrot.lane.b32.xlu0 %v2415_v23, %s2277_s20 }
 0xc2e   : > { %v1189_v2 = vpop.f32.mrb[28].mxu0 }
 0xc2f   : > { %v1196_v3 = vadd.f32 %v1189_v2, %v2494_v57  ;;  %v2068_v4 = vpop.f32.mrb[29].mxu0  ;;  %v2163_v2 = vld [vmem:[%s2666_s2 + $0x58] sm:$0xff]  }
 0xc30   : > { %v1192_v5 = vpop.f32.mrb[30].mxu0  ;;  %v2165_v4 = vld [vmem:[%s2666_s2 + $0x68] sm:$0xff]  }
 0xc31   : > { %v1197_v6 = vadd.f32 %v1192_v5, %v2496_v60  ;;  %v2069_v8 = vpop.f32.mrb[31].mxu0  ;;  %v2166_v5 = vld [vmem:[%s2666_s2 + $0x70] sm:$0xff]  }
 0xc32   : > { %v2168_v8 = vld [vmem:[%s2666_s2 + $0x80] sm:$0xff]  }
 0xc8e   : > { %v1267_v9 = vpop.xlane.xlu0 %1266 }
 0xc8f   : > { %2237 = vrcp.f32 %v1267_v9  ;;  %v2169_v9 = vld [vmem:[%s2666_s2 + $0x88] sm:$0xff]  }
 0xc90   : > { %v1270_v23 = vpop.xlane.xlu1 %1269 }
 0xc91   : > { %2239 = vrcp.f32 %v1270_v23  ;;  %v2170_v23 = vld [vmem:[%s2666_s2 + $0x90] sm:$0xff]  }
 0xc92   : > { %v1277_v10 = vpop.permute.xlu0 %1276 }
 0xc93   : > { %2077 = vmatpush3.bf16.msra.mxu0 %v1277_v10  ;;  %v1903_v10 = vld [vmem:[%s2667_s3 + $0x9] ss:$0 sm:$0xff] }
 0xc94   : > { %2088 = vmatprep.subr.bf16.mxu0 %v2265_v7 }
 0xc99   : > { %v2238_v11 = vpop.eup %2237 }
 0xc9a   : > { %v1273_v13 = vmul.f32 %v2238_v11, %v2234_v35 }
 0xc9b   : > { %v2240_v12 = vpop.eup %2239 }
 0xc9c   : > { %v1274_v14 = vmul.f32 %v2240_v12, %v2236_v63 }
 0xc9e   : > { %v1275_v15 = vpack.c.bf16 %v1274_v14, %v1273_v13 }
 0xca0   : > { %2079 = vmatmul.mubr.msk.bf16.vlgmr.msra.gmra.mrb[32].mxu0 %vm402_vm2, %v1275_v15 }
 0xca1   : > { %2092 = vmatprep.mubr.msk.bf16.mxu0 %vm2266_vm1, %v2265_v7  ;;  %2089 = vmatpush3.bf16.msra.mxu0 %v2161_v45 }
 0xca2   : > { %2090 = vmatprep.subr.bf16.mxu0 %v2265_v7 }
 0xca5   : > { %2091 = vmatpush3.bf16.msra.mxu0 %v2162_v48 }
 0xca6   : > { %2116 = vmatprep.subr.bf16.mxu0 %v2265_v7 }
 0xd73   : > { %v1316_v57 = vpop.f32.mrb[32].mxu0 }
 0xd74   : > { %v2080_v60 = vpop.f32.mrb[33].mxu0 }
 0xd75   : > { %v1319_v16 = vpop.f32.mrb[34].mxu0 }
 0xd76   : > { %v1324_v17 = vpack.c.bf16 %v1319_v16, %v1316_v57  ;;  %v2081_v18 = vpop.f32.mrb[35].mxu0 }
 0xd78   : > { %2085 = vmatmul.mubr.msk.bf16.vlgmr.msra.gmra.mrb[28].mxu1 %vm676_vm4, %v1324_v17 }
 0xd79   : > { %2112 = vmatprep.mubr.msk.bf16.mxu1 %vm2266_vm1, %v2265_v7  ;;  %2097 = vmatpush3.bf16.msra.mxu1 %v2163_v2 }
 0xd7a   : > { %2098 = vmatprep.subr.bf16.mxu1 %v2265_v7 }
 0xe4b   : > { %v1365_v19 = vpop.f32.mrb[28].mxu1 }
 0xe4c   : > { %v1372_v20 = vadd.f32 %v1365_v19, %v1196_v3  ;;  %v2086_v21 = vpop.f32.mrb[29].mxu1  ;;  %v2164_v3 = vld [vmem:[%s2666_s2 + $0x60] sm:$0xff]  }
 0xe4d   : > { %v1368_v24 = vpop.f32.mrb[30].mxu1  ;;  %2099 = vmatpush3.bf16.msra.mxu1 %v2164_v3 }
 0xe4e   : > { %v1374_v25 = vadd.f32 %v1372_v20, %v2383_v46  ;;  %v1373_v26 = vadd.f32 %v1368_v24, %v1197_v6  ;;  %v2087_v27 = vpop.f32.mrb[31].mxu1  ;;  %2100 = vmatprep.subr.bf16.mxu1 %v2265_v7  ;;  %v2167_v6 = vld [vmem:[%s2666_s2 + $0x78] sm:$0xff]  }
 0xe50   : > { %v2557_v28 = vadd.f32 %v1900_v22, %v1374_v25  ;;  %v1375_v31 = vadd.f32 %v1373_v26, %v2385_v47 }
 0xe51   : > { %2101 = vmatpush3.bf16.msra.mxu1 %v2165_v4 }
 0xe52   : > { %v2560_v32 = vadd.f32 %v1900_v22, %v1375_v31  ;;  %v1383_v33 = vsel %vm268_vm0, %v2557_v28, 0.0  ;;  %2102 = vmatprep.subr.bf16.mxu1 %v2265_v7 }
 0xe53   : > { %1384 = vadd.xlane.f32.xlu1 %v1383_v33 }
 0xe54   : > { %v1386_v36 = vsel %vm268_vm0, %v2560_v32, 0.0 }
 0xe55   : > { %2103 = vmatpush3.bf16.msra.mxu1 %v2166_v5 }
 0xe56   : > { %2104 = vmatprep.subr.bf16.mxu1 %v2265_v7 }
 0xe57   : > { %1387 = vadd.xlane.f32.xlu1 %v1386_v36 }
 0xe59   : > { %2105 = vmatpush3.bf16.msra.mxu1 %v2167_v6  ;;  %v1916_v6 = vld [vmem:[%s2667_s3 + $0xb] ss:$0 sm:$0xff] }
 0xe5a   : > { %2106 = vmatprep.subr.bf16.mxu1 %v2265_v7 }
 0xe5d   : > { %2107 = vmatpush3.bf16.msra.mxu1 %v2168_v8 }
 0xe5e   : > { %2108 = vmatprep.subr.bf16.mxu1 %v2265_v7 }
 0xe61   : > { %2109 = vmatpush3.bf16.msra.mxu1 %v2169_v9 }
 0xe62   : > { %2110 = vmatprep.subr.bf16.mxu1 %v2265_v7 }
 0xe65   : > { %2111 = vmatpush3.bf16.msra.mxu1 %v2170_v23 }
 0xee0   : > { %v1385_v37 = vpop.xlane.xlu1 %1384 }
 0xee1   : > { %v1389_v38 = vmul.f32 0.03125, %v1385_v37 }
 0xee3   : > { %v1391_v46 = vsub.f32 %v2557_v28, %v1389_v38 }
 0xee4   : > { %v1388_v34 = vpop.xlane.xlu1 %1387 }
 0xee5   : > { %v1390_v39 = vmul.f32 0.03125, %v1388_v34  ;;  %v1393_v40 = vmul.f32 %v1391_v46, %v1391_v46 }
 0xee7   : > { %v1392_v41 = vsub.f32 %v2560_v32, %v1390_v39  ;;  %v1395_v47 = vsel %vm268_vm0, %v1393_v40, 0.0  ;;  %v1915_v40 = vld [vmem:[%s2667_s3 + $0xa] ss:$0 sm:$0xff] }
 0xee8   : > { %1396 = vadd.xlane.f32.xlu1 %v1395_v47 }
 0xee9   : > { %v1394_v42 = vmul.f32 %v1392_v41, %v1392_v41 }
 0xeeb   : > { %v1398_v43 = vsel %vm268_vm0, %v1394_v42, 0.0 }
 0xeec   : > { %1399 = vadd.xlane.f32.xlu1 %v1398_v43 }
 0xf75   : > { %v1397_v49 = vpop.xlane.xlu1 %1396 }
 0xf76   : > { %v1401_v50 = vmul.f32 0.03125, %v1397_v49 }
 0xf78   : > { %v1403_v51 = vadd.f32 1e-05, %v1401_v50 }
 0xf79   : > { %v1400_v52 = vpop.xlane.xlu1 %1399 }
 0xf7a   : > { %2241 = vrsqrt.f32 %v1403_v51  ;;  %v1402_v53 = vmul.f32 0.03125, %v1400_v52 }
 0xf7c   : > { %v1404_v54 = vadd.f32 1e-05, %v1402_v53 }
 0xf7e   : > { %2243 = vrsqrt.f32 %v1404_v54 }
 0xf84   : > { %v2242_v55 = vpop.eup %2241 }
 0xf85   : > { %v1407_v56 = vmul.f32 %v2242_v55, %v1391_v46 }
 0xf87   : > { %v1414_v61 = vmul.f32 %v1901_v58, %v1407_v56 }
 0xf88   : > { %v2244_v59 = vpop.eup %2243 }
 0xf89   : > { %v1408_v35 = vmul.f32 %v2244_v59, %v1392_v41  ;;  %v1421_v0 = vadd.f32 %v1902_v62, %v1414_v61 }
 0xf8b   : > { %v1415_v63 = vmul.f32 %v1901_v58, %v1408_v35  ;;  %v2171_v35 = vld [vmem:[%s2666_s2 + $0x98] sm:$0xff]  }
 0xf8d   : > { %v1422_v30 = vadd.f32 %v1902_v62, %v1415_v63  ;;  %v2172_v62 = vld [vmem:[%s2666_s2 + $0xa0] sm:$0xff]  }
 0xf8f   : > { %v1423_v1 = vpack.c.bf16 %v1422_v30, %v1421_v0 }
 0xf91   : > { %2093 = vmatmul.mubr.msk.bf16.vlgmr.msra.gmra.mrb[36].mxu0 %vm268_vm0, %v1423_v1 }
 0xf92   : > { %2120 = vmatprep.mubr.msk.bf16.mxu0 %vm2266_vm1, %v2265_v7  ;;  %2117 = vmatpush3.bf16.msra.mxu0 %v2171_v35 }
 0xf93   : > { %2118 = vmatprep.subr.bf16.mxu0 %v2265_v7 }
 0xf96   : > { %2119 = vmatpush3.bf16.msra.mxu0 %v2172_v62 }
0x1064   : > { %v1482_v11 = vpop.f32.mrb[36].mxu0 }
0x1065   : > { %v1483_v12 = vadd.f32 %v1903_v10, %v1482_v11  ;;  %v2094_v13 = vpop.f32.mrb[37].mxu0 }
0x1066   : > { %v1485_v14 = vpop.f32.mrb[38].mxu0 }
0x1067   : > { %v1489_v15 = vmul.f32 %v1483_v12, %v1483_v12  ;;  %v1486_v57 = vadd.f32 %v1903_v10, %v1485_v14  ;;  %v2095_v60 = vpop.f32.mrb[39].mxu0  ;;  %v1917_v10 = vld [vmem:[%s2667_s3 + $0xc] ss:$0 sm:$0xff] }
0x1069   : > { %v1491_v16 = vmul.f32 %v1489_v15, %v1483_v12  ;;  %v1490_v17 = vmul.f32 %v1486_v57, %v1486_v57  ;;  %v2278_v15 = vmov 32  }
0x106a   : > { %2148 = vset.pattern.permute.xlu1 %v2278_v15  ;;  %2149 = vset.pattern.permute.xlu0 %v2278_v15 }
0x106b   : > { %v1493_v18 = vmul.f32 0.044715, %v1491_v16  ;;  %v1492_v19 = vmul.f32 %v1490_v17, %v1486_v57 }
0x106d   : > { %v1495_v20 = vadd.f32 %v1493_v18, %v1483_v12  ;;  %v1494_v21 = vmul.f32 0.044715, %v1492_v19 }
0x106f   : > { %v1497_v22 = vmul.f32 0.7978846, %v1495_v20  ;;  %v1496_v24 = vadd.f32 %v1494_v21, %v1486_v57 }
0x1071   : > { %2245 = vtanh.f32 %v1497_v22  ;;  %v1498_v25 = vmul.f32 0.7978846, %v1496_v24  ;;  %v2124_v24 = vtrunc.f32 %v2380_v44 }
0x1073   : > { %2247 = vtanh.f32 %v1498_v25  ;;  %v2125_v25 = vcvt.f32.s32 %v2124_v24 }
0x107b   : > { %v2246_v26 = vpop.eup %2245 }
0x107c   : > { %v1501_v27 = vadd.f32 1.0, %v2246_v26 }
0x107d   : > { %v2248_v31 = vpop.eup %2247 }
0x107e   : > { %v1503_v33 = vmul.f32 0.5, %v1501_v27  ;;  %v1502_v36 = vadd.f32 1.0, %v2248_v31 }
0x1080   : > { %v1504_v37 = vmul.f32 0.5, %v1502_v36  ;;  %v1505_v38 = vmul.f32 %v1503_v33, %v1483_v12 }
0x1082   : > { %v1506_v46 = vmul.f32 %v1504_v37, %v1486_v57  ;;  %v1918_v57 = vld [vmem:[%s2667_s3 + $0xd] ss:$0 sm:$0xff] }
0x1084   : > { %v1507_v34 = vpack.c.bf16 %v1506_v46, %v1505_v38 }
0x1086   : > { %2113 = vmatmul.mubr.bf16.vlgmr.msra.gmra.mrb[32].mxu1 %v1507_v34 }
0x1159   : > { %v1606_v39 = vpop.f32.mrb[32].mxu1 }
0x115a   : > { %v1613_v41 = vadd.f32 %v1606_v39, %v2557_v28  ;;  %v2114_v47 = vpop.f32.mrb[33].mxu1 }
0x115b   : > { %v1609_v42 = vpop.f32.mrb[34].mxu1 }
0x115c   : > { %v1614_v43 = vadd.f32 %v1609_v42, %v2560_v32  ;;  %v2115_v45 = vpop.f32.mrb[35].mxu1  ;;  %v1620_v48 = vadd.f32 %v1915_v40, %v1613_v41 }
0x115e   : > { %v1622_v49 = vsel %vm268_vm0, %v1620_v48, 0.0  ;;  %v1621_v50 = vadd.f32 %v1915_v40, %v1614_v43 }
0x115f   : > { %1623 = vadd.xlane.f32.xlu1 %v1622_v49 }
0x1160   : > { %v1625_v51 = vsel %vm268_vm0, %v1621_v50, 0.0 }
0x1163   : > { %1626 = vadd.xlane.f32.xlu1 %v1625_v51 }
0x11ec   : > { %v1624_v52 = vpop.xlane.xlu1 %1623 }
0x11ed   : > { %v1628_v53 = vmul.f32 0.03125, %v1624_v52 }
0x11ef   : > { %v1630_v54 = vsub.f32 %v1620_v48, %v1628_v53 }
0x11f0   : > { %v1627_v55 = vpop.xlane.xlu1 %1626 }
0x11f1   : > { %v1629_v56 = vmul.f32 0.03125, %v1627_v55  ;;  %v1632_v58 = vmul.f32 %v1630_v54, %v1630_v54 }
0x11f3   : > { %v1631_v28 = vsub.f32 %v1621_v50, %v1629_v56  ;;  %v1634_v59 = vsel %vm268_vm0, %v1632_v58, 0.0 }
0x11f4   : > { %1635 = vadd.xlane.f32.xlu0 %v1634_v59 }
0x11f5   : > { %v1633_v32 = vmul.f32 %v1631_v28, %v1631_v28 }
0x11f7   : > { %v1637_v61 = vsel %vm268_vm0, %v1633_v32, 0.0 }
0x11f8   : > { %1638 = vadd.xlane.f32.xlu1 %v1637_v61 }
0x1281   : > { %v1636_v63 = vpop.xlane.xlu0 %1635 }
0x1282   : > { %v1640_v0 = vmul.f32 0.03125, %v1636_v63 }
0x1284   : > { %v1642_v30 = vadd.f32 1e-05, %v1640_v0 }
0x1285   : > { %v1639_v1 = vpop.xlane.xlu1 %1638 }
0x1286   : > { %2249 = vrsqrt.f32 %v1642_v30  ;;  %v1641_v2 = vmul.f32 0.03125, %v1639_v1 }
0x1288   : > { %v1643_v3 = vadd.f32 1e-05, %v1641_v2 }
0x128a   : > { %2251 = vrsqrt.f32 %v1643_v3 }
0x1290   : > { %v2250_v4 = vpop.eup %2249 }
0x1291   : > { %v1646_v5 = vmul.f32 %v2250_v4, %v1630_v54 }
0x1293   : > { %v1653_v9 = vmul.f32 %v1916_v6, %v1646_v5 }
0x1294   : > { %v2252_v8 = vpop.eup %2251 }
0x1295   : > { %v1647_v23 = vmul.f32 %v2252_v8, %v1631_v28  ;;  %v1660_v12 = vadd.f32 %v1917_v10, %v1653_v9 }
0x1297   : > { %v1654_v11 = vmul.f32 %v1916_v6, %v1647_v23 }
0x1299   : > { %v1661_v13 = vadd.f32 %v1917_v10, %v1654_v11 }
0x129b   : > { %v1662_v14 = vpack.c.bf16 %v1661_v13, %v1660_v12 }
0x129d   : > { %2121 = vmatmul.mubr.msk.bf16.vlgmr.msra.gmra.mrb[40].mxu0 %vm268_vm0, %v1662_v14 }
0x1370   : > { %v1721_v60 = vpop.f32.mrb[40].mxu0 }
0x1371   : > { %v1722_v16 = vadd.f32 %v1918_v57, %v1721_v60  ;;  %v2122_v17 = vpop.f32.mrb[41].mxu0 }
0x1372   : > { %v1724_v18 = vpop.f32.mrb[42].mxu0 }
0x1373   : > { %v1725_v19 = vadd.f32 %v1918_v57, %v1724_v18  ;;  %v2123_v20 = vpop.f32.mrb[43].mxu0  ;;  %v1729_v21 = vsel %vm1728_vm8, %v1722_v16, -1e+30 }
0x1374   : > { %1731 = vmax.xlane.f32.xlu1 %v1729_v21 }
0x1375   : > { %v1777_v22 = vsel %vm1775_vm9, 0.0, %v1725_v19 }
0x1376   : > { %1779 = vst [vmem:[%s217_s19 + $0x8] sm:$0xff] %v1777_v22 }
0x1385   : > { %1752 = vperm.xlu1 %2148, %v2125_v25  }
0x1401   : > { %v1732_v26 = vpop.xlane.xlu1 %1731 }
0x1402   : > { %v1735_v27 = vsub.f32 %v1729_v21, %v1732_v26 }
0x1404   : > { %v1737_v31 = vmul.f32 1.442695, %v1735_v27 }
0x1405   : > { %v1753_v33 = vpop.permute.xlu1 %1752 }
0x1406   : > { %2253 = vpow2.f32 %v1737_v31  ;;  %vm1757_vm10 = vcmp.eq.s32.totalorder %v2432_v29, %v1753_v33 }
0x1407   : > { %v1922_v36 = vsel %vm1757_vm10, 1.0, %v2265_v7 }
0x1408   : > { %v1763_v37 = vmul.f32 %v1922_v36, %v1729_v21 }
0x140a   : > { %1765 = vadd.xlane.f32.xlu0 %v1763_v37 }
0x1410   : > { %v2254_v38 = vpop.eup %2253 }
0x1411   : > { %1741 = vadd.xlane.f32.xlu1 %v2254_v38 }
0x1497   : > { %v1766_v40 = vpop.xlane.xlu0 %1765 }
0x149e   : > { %v1742_v46 = vpop.xlane.xlu1 %1741 }
0x149f   : > { %2255 = vlog2.f32 %v1742_v46 }
0x14a9   : > { %v2256_v34 = vpop.eup %2255 }
0x14aa   : > { %v1746_v39 = vmul.f32 0.6931472, %v2256_v34 }
0x14ac   : > { %v1749_v44 = vadd.f32 %v1746_v39, %v1732_v26 }
0x14ae   : > { %v1771_v41 = vsub.f32 %v1749_v44, %v1766_v40 }
0x14b0   : > { %v1776_v47 = vsel %vm1775_vm9, %v1771_v41, %v1722_v16 }
0x14b1   : > { %1778 = vst [vmem:[%s217_s19] sm:$0xff] %v1776_v47 }
0x14b2 PF: > { %s14_s15 = sadd.s32 1, %s2263_s15  }
0x14b3   : > { %p11_p4 = scmp.ge.s32.totalorder %s14_s15, 4  }
0x14b5   :  { %13 = sbr.rel (!%p11_p4) target bundleno = 1 (0x1), region = 69 }

</bundles_post_ra>
